<compile_context>
chip_gen: v6e
topology: v6e:2x2x1
jax: 0.10.0
libtpu: 0.0.40
codegen_flags: <defaults>
</compile_context>

<pallas_src>
import functools

import numpy as np

import jax
import jax.numpy as jnp
from jax.experimental import pallas as pl
from jax.experimental.pallas import tpu as pltpu

N_CLASSES = 2
_BN_EPS = 1e-5
_VMEM_SPEC = pl.BlockSpec(memory_space=pltpu.MemorySpace.VMEM)


# ----------------------------------------------------------------------------
# Static architecture / tiling configuration (pure Python, no arrays).
# ----------------------------------------------------------------------------
def _round_up(x, m):
    return (x + m - 1) // m * m


def _m_tile(M):
    """Row tile / padded rows.  >=512 rows -> 512-row tiles; otherwise a single
    tile rounded up to a multiple of 16 (bf16 packs 16 rows per vreg)."""
    if M >= 512:
        return 512, _round_up(M, 512)
    t = _round_up(M, 16)
    return t, t


def _k_tile(Kp):
    """Largest K tile (multiple of 128, <= 1024) that divides Kp."""
    if Kp <= 1024:
        return Kp
    for cand in range(1024, 127, -128):
        if Kp % cand == 0:
            return cand
    return 128


def _n_tile(Np):
    if Np <= 512:
        return Np
    for cand in (512, 384, 256, 128):
        if Np % cand == 0:
            return cand
    return 128


def _conv_cfg(kh, kw, cin, cin_pad, cout):
    # Contraction runs over the *channel-padded* input layout.
    K = kh * kw * cin_pad
    Kp = _round_up(K, 128)
    Np = _round_up(cout, 128)
    return dict(kh=kh, kw=kw, cin=cin, cin_pad=cin_pad, cout=cout,
                K=K, Kp=Kp, tk=_k_tile(Kp), Np=Np, tn=_n_tile(Np))


LAYER_CFG = [(3, 64, 1), (4, 128, 2), (6, 256, 2), (3, 512, 2)]   # resnet-50
STEM_CFG = _conv_cfg(7, 7, 3, 3, 64)


def _build_arch():
    arch = []
    in_c = 64
    carry = STEM_CFG["Np"]          # channel-padded width of the running activation
    for (nblocks, width, stride) in LAYER_CFG:
        for bi in range(nblocks):
            s = stride if bi == 0 else 1
            c1 = _conv_cfg(1, 1, in_c, carry, width)
            c2 = _conv_cfg(3, 3, width, c1["Np"], width)
            c3 = _conv_cfg(1, 1, width, c2["Np"], width * 4)
            ds = _conv_cfg(1, 1, in_c, carry, width * 4) if bi == 0 else None
            arch.append(dict(conv1=c1, conv2=c2, conv3=c3, downsample=ds, stride=s))
            in_c = width * 4
            carry = c3["Np"]
    return arch


ARCH = _build_arch()


# ----------------------------------------------------------------------------
# Pallas kernels.
# ----------------------------------------------------------------------------
def _mm_stats_kernel(a_ref, w_ref, y_ref, s_ref, ss_ref, acc_ref):
    """Tiled bf16 matmul (f32 accumulate) + per-M-tile BN partial statistics.

    grid = (N_tiles, M_tiles, K_tiles).  The bf16 output and the per-tile
    (1, 8, tn) stats blocks are written only on the last K step; stats blocks
    are distinct per (M-tile, N-tile), so both M and N axes are 'parallel'.
    """
    k = pl.program_id(2)

    @pl.when(k == 0)
    def _():
        acc_ref[...] = jnp.zeros_like(acc_ref)

    acc_ref[...] += jnp.dot(a_ref[...], w_ref[...],
                            preferred_element_type=jnp.float32)

    @pl.when(k == pl.num_programs(2) - 1)
    def _():
        y = acc_ref[...]
        y_ref[...] = y.astype(y_ref.dtype)
        tm, tn = y.shape
        ps = y.reshape(tm // 8, 8, tn)          # vreg-aligned regrouping
        s_ref[0] = jnp.sum(ps, axis=0)          # (8, tn) partial column sums
        ss_ref[0] = jnp.sum(ps * ps, axis=0)    # (8, tn) partial column sumsq


def _bn_apply_kernel(y_ref, s_ref, ss_ref, g_ref, b_ref, o_ref, *, inv_m, relu):
    x = y_ref[...].astype(jnp.float32)
    mean = s_ref[...] * inv_m
    var = jnp.maximum(ss_ref[...] * inv_m - mean * mean, 0.0)   # clamp cancellation
    y = (x - mean) * jax.lax.rsqrt(var + _BN_EPS) * g_ref[...] + b_ref[...]
    if relu:
        y = jnp.maximum(y, 0.0)
    o_ref[...] = y.astype(o_ref.dtype)


def _bn_apply_res_kernel(y_ref, s_ref, ss_ref, g_ref, b_ref, r_ref, o_ref, *,
                         inv_m, relu):
    x = y_ref[...].astype(jnp.float32)
    mean = s_ref[...] * inv_m
    var = jnp.maximum(ss_ref[...] * inv_m - mean * mean, 0.0)
    y = (x - mean) * jax.lax.rsqrt(var + _BN_EPS) * g_ref[...] + b_ref[...]
    y = y + r_ref[...].astype(jnp.float32)
    if relu:
        y = jnp.maximum(y, 0.0)
    o_ref[...] = y.astype(o_ref.dtype)


def _maxpool_kernel(p_ref, o_ref, *, kk):
    acc = p_ref[0]
    for idx in range(1, kk):
        acc = jnp.maximum(acc, p_ref[idx])
    o_ref[...] = acc


def _avgpool_fc_kernel(x_ref, w_ref, b_ref, o_ref, *, inv_hw):
    # Spatial mean in f32 on the VPU (no dense selector matrix), tiny bf16 matmul.
    feat = jnp.sum(x_ref[...].astype(jnp.float32), axis=1) * inv_hw    # (Bp, C)
    o_ref[...] = jnp.dot(feat.astype(jnp.bfloat16), w_ref[...],
                         preferred_element_type=jnp.float32) + b_ref[...]


# ----------------------------------------------------------------------------
# Plain-JAX glue (fused into the per-layer jitted wrappers below).
# ----------------------------------------------------------------------------
# TODO(synk): the kh*kw tap gather (im2col / pool windows) is still XLA-side
# data movement; an in-kernel DMA gather over spatial tiles would remove the
# kh*kw activation-traffic blow-up for 3x3 layers at large input sizes.
def _im2col(x, kh, kw, stride, pad):
    B, H, W, C = x.shape
    Ho = (H + 2 * pad - kh) // stride + 1
    Wo = (W + 2 * pad - kw) // stride + 1
    xp = jnp.pad(x, ((0, 0), (pad, pad), (pad, pad), (0, 0)))
    cols = []
    for i in range(kh):
        for j in range(kw):
            cols.append(xp[:, i:i + stride * Ho:stride, j:j + stride * Wo:stride, :])
    patches = jnp.stack(cols, axis=3)                  # (B, Ho, Wo, kh*kw, C)
    return patches.reshape(B * Ho * Wo, kh * kw * C), Ho, Wo


# ----------------------------------------------------------------------------
# Fused conv + BatchNorm(train) [+ residual] [+ ReLU]   (two Pallas passes).
# ----------------------------------------------------------------------------
@functools.lru_cache(maxsize=None)
def _conv_bn_fn(B, H, W, Cx, kh, kw, stride, K, Kp, tk, Np, tn, relu, has_res):
    pad = (kh - 1) // 2
    Ho = (H + 2 * pad - kh) // stride + 1
    Wo = (W + 2 * pad - kw) // stride + 1
    M = B * Ho * Wo
    tm, Mp = _m_tile(M)
    nM, nN, nK = Mp // tm, Np // tn, Kp // tk

    def f(x, w_p, gamma_p, beta_p, *maybe_res):
        x = x.astype(jnp.bfloat16)
        if kh == 1 and kw == 1:
            xs = x if stride == 1 else x[:, ::stride, ::stride, :]
            A = xs.reshape(M, K)                        # 1x1 conv: no im2col
        else:
            A, _, _ = _im2col(x, kh, kw, stride, pad)   # bf16 patch matrix
        A_p = A
        if Mp > M or Kp > K:
            A_p = jnp.pad(A, ((0, Mp - M), (0, Kp - K)))

        # Pass 1: tiled bf16 MXU matmul + per-M-tile BN partial statistics.
        y, s_part, ss_part = pl.pallas_call(
            _mm_stats_kernel,
            out_shape=(jax.ShapeDtypeStruct((Mp, Np), jnp.bfloat16),
                       jax.ShapeDtypeStruct((nM, 8, Np), jnp.float32),
                       jax.ShapeDtypeStruct((nM, 8, Np), jnp.float32)),
            grid_spec=pltpu.PrefetchScalarGridSpec(
                num_scalar_prefetch=0,
                grid=(nN, nM, nK),
                in_specs=[pl.BlockSpec((tm, tk), lambda j, i, k: (i, k)),
                          pl.BlockSpec((tk, tn), lambda j, i, k: (k, j))],
                out_specs=(pl.BlockSpec((tm, tn), lambda j, i, k: (i, j)),
                           pl.BlockSpec((1, 8, tn), lambda j, i, k: (i, 0, j)),
                           pl.BlockSpec((1, 8, tn), lambda j, i, k: (i, 0, j))),
                scratch_shapes=[pltpu.VMEM((tm, tn), jnp.float32)]),
            compiler_params=pltpu.CompilerParams(
                dimension_semantics=("parallel", "parallel", "arbitrary")),
        )(A_p, w_p)

        # Combine the tiny per-tile partials in f32 (XLA).
        s = jnp.sum(s_part, axis=(0, 1)).reshape(1, Np)
        ss = jnp.sum(ss_part, axis=(0, 1)).reshape(1, Np)

        # Pass 2: apply BN (+ residual) (+ ReLU), fully parallel grid, f32 math.
        inputs = [y, s, ss, gamma_p, beta_p]
        in_specs = [pl.BlockSpec((tm, tn), lambda i, j: (i, j)),
                    pl.BlockSpec((1, tn), lambda i, j: (0, j)),
                    pl.BlockSpec((1, tn), lambda i, j: (0, j)),
                    pl.BlockSpec((1, tn), lambda i, j: (0, j)),
                    pl.BlockSpec((1, tn), lambda i, j: (0, j))]
        if has_res:
            r = maybe_res[0].reshape(M, Np).astype(jnp.bfloat16)
            if Mp > M:
                r = jnp.pad(r, ((0, Mp - M), (0, 0)))
            inputs.append(r)
            in_specs.append(pl.BlockSpec((tm, tn), lambda i, j: (i, j)))
            kern = functools.partial(_bn_apply_res_kernel, inv_m=1.0 / M, relu=relu)
        else:
            kern = functools.partial(_bn_apply_kernel, inv_m=1.0 / M, relu=relu)

        out = pl.pallas_call(
            kern,
            out_shape=jax.ShapeDtypeStruct((Mp, Np), jnp.bfloat16),
            grid_spec=pltpu.PrefetchScalarGridSpec(
                num_scalar_prefetch=0,
                grid=(nM, nN),
                in_specs=in_specs,
                out_specs=pl.BlockSpec((tm, tn), lambda i, j: (i, j))),
            compiler_params=pltpu.CompilerParams(
                dimension_semantics=("parallel", "parallel")),
        )(*inputs)

        if Mp > M:
            out = out[:M]
        # Keep the channel-padded layout between layers (only row-pad removed).
        return out.reshape(B, Ho, Wo, Np)

    return jax.jit(f)


def conv_bn(x, p, cfg, stride, relu=True, residual=None):
    B, H, W, Cx = x.shape
    assert cfg["K"] == cfg["kh"] * cfg["kw"] * Cx
    fn = _conv_bn_fn(B, H, W, Cx, cfg["kh"], cfg["kw"], stride,
                     cfg["K"], cfg["Kp"], cfg["tk"], cfg["Np"], cfg["tn"],
                     bool(relu), residual is not None)
    if residual is None:
        return fn(x, p["w"], p["gamma"], p["beta"])
    return fn(x, p["w"], p["gamma"], p["beta"], residual)


# ----------------------------------------------------------------------------
# MaxPool2d(kernel=3, stride=2, padding=1), tiled over rows / channels (bf16).
# ----------------------------------------------------------------------------
# TODO(synk): the 9-tap stack still materializes ~k*k x the activation in HBM;
# an in-kernel halo read (one padded row-tile per grid step) would cut that.
@functools.lru_cache(maxsize=None)
def _maxpool_fn(B, H, W, C, k, stride, pad):
    Ho = (H + 2 * pad - k) // stride + 1
    Wo = (W + 2 * pad - k) // stride + 1
    M = B * Ho * Wo
    tm, Mp = _m_tile(M)
    Cp = _round_up(C, 128)
    tc = _n_tile(Cp)
    neg = float("-inf")

    def f(x):
        x = x.astype(jnp.bfloat16)
        xp = jnp.pad(x, ((0, 0), (pad, pad), (pad, pad), (0, 0)),
                     constant_values=neg)
        pats = [xp[:, i:i + stride * Ho:stride, j:j + stride * Wo:stride, :]
                .reshape(M, C) for i in range(k) for j in range(k)]
        P = jnp.stack(pats, axis=0)                     # (k*k, M, C) bf16
        if Mp > M or Cp > C:
            P = jnp.pad(P, ((0, 0), (0, Mp - M), (0, Cp - C)),
                        constant_values=neg)
        out = pl.pallas_call(
            functools.partial(_maxpool_kernel, kk=k * k),
            out_shape=jax.ShapeDtypeStruct((Mp, Cp), jnp.bfloat16),
            grid_spec=pltpu.PrefetchScalarGridSpec(
                num_scalar_prefetch=0,
                grid=(Mp // tm, Cp // tc),
                in_specs=[pl.BlockSpec((k * k, tm, tc), lambda i, j: (0, i, j))],
                out_specs=pl.BlockSpec((tm, tc), lambda i, j: (i, j))),
            compiler_params=pltpu.CompilerParams(
                dimension_semantics=("parallel", "parallel")),
        )(P)
        return out[:M, :C].reshape(B, Ho, Wo, C)

    return jax.jit(f)


def maxpool(x, k=3, stride=2, pad=1):
    B, H, W, C = x.shape
    return _maxpool_fn(B, H, W, C, k, stride, pad)(x)


# ----------------------------------------------------------------------------
# Adaptive avgpool (1,1) + flatten + FC head, one small kernel.
# ----------------------------------------------------------------------------
@functools.lru_cache(maxsize=None)
def _avgpool_fc_fn(B, Ho, Wo, C, Ncp):
    HW = Ho * Wo
    Bp = _round_up(B, 8)

    def f(x, w_p, b_p):
        X = x.reshape(B, HW, C).astype(jnp.bfloat16)
        if Bp > B:
            X = jnp.pad(X, ((0, Bp - B), (0, 0), (0, 0)))
        out = pl.pallas_call(
            functools.partial(_avgpool_fc_kernel, inv_hw=1.0 / HW),
            out_shape=jax.ShapeDtypeStruct((Bp, Ncp), jnp.float32),
            in_specs=[_VMEM_SPEC] * 3,
            out_specs=_VMEM_SPEC,
        )(X, w_p, b_p)
        return out[:B, :N_CLASSES]

    return jax.jit(f)


def avgpool_fc(x, w_p, b_p):
    B, Ho, Wo, C = x.shape
    assert C == w_p.shape[0]
    return _avgpool_fc_fn(B, Ho, Wo, C, w_p.shape[1])(x, w_p, b_p)


# ----------------------------------------------------------------------------
# Parameter init: weights padded to the kernel layout and cast to bf16 ONCE.
# ----------------------------------------------------------------------------
def _init_conv_params(key, cfg):
    kh, kw = cfg["kh"], cfg["kw"]
    cin, cin_pad = cfg["cin"], cfg["cin_pad"]
    cout, K, Kp, Np = cfg["cout"], cfg["K"], cfg["Kp"], cfg["Np"]
    w = jax.random.normal(key, (kh, kw, cin, cout), jnp.float32)
    w = w * np.sqrt(2.0 / (kh * kw * cin))
    # Scatter actual channels into the channel-padded contraction layout.
    w = jnp.pad(w, ((0, 0), (0, 0), (0, cin_pad - cin), (0, Np - cout)))
    w = w.reshape(K, Np)
    if Kp > K:
        w = jnp.pad(w, ((0, Kp - K), (0, 0)))
    return {
        "w": w.astype(jnp.bfloat16),
        "gamma": jnp.pad(jnp.ones((cout,), jnp.float32),
                         (0, Np - cout)).reshape(1, Np),
        "beta": jnp.zeros((1, Np), jnp.float32),
    }


def init_params(seed=0):
    base = jax.random.PRNGKey(seed)
    ctr = [0]

    def nk():
        ctr[0] += 1
        return jax.random.fold_in(base, ctr[0])

    params = {"stem": _init_conv_params(nk(), STEM_CFG), "blocks": []}
    for blk_c in ARCH:
        blk = {"conv1": _init_conv_params(nk(), blk_c["conv1"]),
               "conv2": _init_conv_params(nk(), blk_c["conv2"]),
               "conv3": _init_conv_params(nk(), blk_c["conv3"])}
        if blk_c["downsample"] is not None:
            blk["downsample"] = _init_conv_params(nk(), blk_c["downsample"])
        params["blocks"].append(blk)

    c_final = ARCH[-1]["conv3"]["Np"]                 # 2048 (already 128-aligned)
    ncp = _round_up(N_CLASSES, 128)
    fc_w = jax.random.normal(nk(), (2048, N_CLASSES), jnp.float32) / np.sqrt(2048.0)
    fc_w = jnp.pad(fc_w, ((0, c_final - 2048), (0, ncp - N_CLASSES)))
    params["fc_w"] = fc_w.astype(jnp.bfloat16)
    params["fc_b"] = jnp.zeros((1, ncp), jnp.float32)
    return params


# ----------------------------------------------------------------------------
# Forward pass (mirrors MyResnet.forward; BN in training mode / batch stats).
# ----------------------------------------------------------------------------
def forward(params, x_nchw):
    x = jnp.transpose(x_nchw, (0, 2, 3, 1)).astype(jnp.bfloat16)   # NCHW -> NHWC

    # stem: conv7x7 s2 + BN + ReLU, maxpool 3x3 s2
    x = conv_bn(x, params["stem"], STEM_CFG, stride=2, relu=True)
    x = maxpool(x)

    # layer1..layer4 (bottleneck blocks); activations stay channel-padded bf16.
    for blk_p, blk_c in zip(params["blocks"], ARCH):
        identity = x
        out = conv_bn(x, blk_p["conv1"], blk_c["conv1"], stride=1, relu=True)
        out = conv_bn(out, blk_p["conv2"], blk_c["conv2"], stride=blk_c["stride"],
                      relu=True)
        if "downsample" in blk_p:
            identity = conv_bn(x, blk_p["downsample"], blk_c["downsample"],
                               stride=blk_c["stride"], relu=False)
        x = conv_bn(out, blk_p["conv3"], blk_c["conv3"], stride=1, relu=True,
                    residual=identity)

    # adaptive avgpool(1,1) + flatten + fc
    return avgpool_fc(x, params["fc_w"], params["fc_b"])


if __name__ == "__main__":
    key = jax.random.PRNGKey(0)
    x = jax.random.normal(key, (2, 3, 32, 32), jnp.float32)   # NCHW, like PyTorch
    params = init_params(seed=0)
    logits = forward(params, x)
    logits = jax.block_until_ready(logits)
    assert logits.shape == (2, N_CLASSES), logits.shape
    assert bool(jnp.all(jnp.isfinite(logits)))
    print("KERNEL_OK")
</pallas_src>

<mosaic_0001>
module attributes {stable_mosaic.version = 11 : i64} {
  func.func @_bn_apply_kernel(%arg0: i32, %arg1: i32, %arg2: memref<512x128xbf16, #tpu.memory_space<vmem>>, %arg3: memref<1x128xf32, #tpu.memory_space<vmem>>, %arg4: memref<1x128xf32, #tpu.memory_space<vmem>>, %arg5: memref<1x128xf32, #tpu.memory_space<vmem>>, %arg6: memref<1x128xf32, #tpu.memory_space<vmem>>, %arg7: memref<512x128xbf16, #tpu.memory_space<vmem>>) attributes {dimension_semantics = [#tpu.dimension_semantics<parallel>, #tpu.dimension_semantics<parallel>], iteration_bounds = array<i64: 1, 1>, scalar_prefetch = 0 : i64, scratch_operands = 0 : i64, tpu.core_type = #tpu.core_type<tc>, window_params = [{transform_indices = @transform_0, window_bounds = array<i64: 512, 128>}, {transform_indices = @transform_1, window_bounds = array<i64: 1, 128>}, {transform_indices = @transform_2, window_bounds = array<i64: 1, 128>}, {transform_indices = @transform_3, window_bounds = array<i64: 1, 128>}, {transform_indices = @transform_4, window_bounds = array<i64: 1, 128>}, {transform_indices = @transform_5, window_bounds = array<i64: 512, 128>}]} {
    %c0 = arith.constant 0 : index
    %c0_0 = arith.constant 0 : index
    %0 = vector.load %arg2[%c0, %c0_0] : memref<512x128xbf16, #tpu.memory_space<vmem>>, vector<512x128xbf16>
    %1 = arith.extf %0 : vector<512x128xbf16> to vector<512x128xf32>
    %c0_1 = arith.constant 0 : index
    %c0_2 = arith.constant 0 : index
    %2 = vector.load %arg3[%c0_1, %c0_2] : memref<1x128xf32, #tpu.memory_space<vmem>>, vector<1x128xf32>
    %cst = arith.constant 0.001953125 : f32
    %3 = vector.broadcast %cst : f32 to vector<1x128xf32>
    %4 = arith.mulf %2, %3 : vector<1x128xf32>
    %c0_3 = arith.constant 0 : index
    %c0_4 = arith.constant 0 : index
    %5 = vector.load %arg4[%c0_3, %c0_4] : memref<1x128xf32, #tpu.memory_space<vmem>>, vector<1x128xf32>
    %cst_5 = arith.constant 0.001953125 : f32
    %6 = vector.broadcast %cst_5 : f32 to vector<1x128xf32>
    %7 = arith.mulf %5, %6 : vector<1x128xf32>
    %8 = arith.mulf %4, %4 : vector<1x128xf32>
    %9 = arith.subf %7, %8 : vector<1x128xf32>
    %cst_6 = arith.constant 0.000000e+00 : f32
    %10 = vector.broadcast %cst_6 : f32 to vector<1x128xf32>
    %11 = arith.maximumf %9, %10 : vector<1x128xf32>
    %12 = vector.broadcast %4 : vector<1x128xf32> to vector<512x128xf32>
    %13 = arith.subf %1, %12 : vector<512x128xf32>
    %cst_7 = arith.constant 9.99999974E-6 : f32
    %14 = vector.broadcast %cst_7 : f32 to vector<1x128xf32>
    %15 = arith.addf %11, %14 : vector<1x128xf32>
    %16 = math.rsqrt %15 : vector<1x128xf32>
    %17 = vector.broadcast %16 : vector<1x128xf32> to vector<512x128xf32>
    %18 = arith.mulf %13, %17 : vector<512x128xf32>
    %c0_8 = arith.constant 0 : index
    %c0_9 = arith.constant 0 : index
    %19 = vector.load %arg5[%c0_8, %c0_9] : memref<1x128xf32, #tpu.memory_space<vmem>>, vector<1x128xf32>
    %20 = vector.broadcast %19 : vector<1x128xf32> to vector<512x128xf32>
    %21 = arith.mulf %18, %20 : vector<512x128xf32>
    %c0_10 = arith.constant 0 : index
    %c0_11 = arith.constant 0 : index
    %22 = vector.load %arg6[%c0_10, %c0_11] : memref<1x128xf32, #tpu.memory_space<vmem>>, vector<1x128xf32>
    %23 = vector.broadcast %22 : vector<1x128xf32> to vector<512x128xf32>
    %24 = arith.addf %21, %23 : vector<512x128xf32>
    %cst_12 = arith.constant 0.000000e+00 : f32
    %25 = vector.broadcast %cst_12 : f32 to vector<512x128xf32>
    %26 = arith.maximumf %24, %25 : vector<512x128xf32>
    %27 = arith.truncf %26 : vector<512x128xf32> to vector<512x128xbf16>
    %c0_13 = arith.constant 0 : index
    %c0_14 = arith.constant 0 : index
    %28 = vector.load %arg7[%c0_13, %c0_14] : memref<512x128xbf16, #tpu.memory_space<vmem>>, vector<512x128xbf16>
    tpu.vector_store %arg7[%c0_13, %c0_14], %27 {strides = array<i32>} : memref<512x128xbf16, #tpu.memory_space<vmem>>, vector<512x128xbf16>,
    return
  }
  func.func @transform_0(%arg0: i32, %arg1: i32) -> (i32, i32) {
    %c0_i32 = arith.constant 0 : i32
    return %arg0, %arg1 : i32, i32
  }
  func.func @transform_1(%arg0: i32, %arg1: i32) -> (i32, i32) {
    %c0_i32 = arith.constant 0 : i32
    %c0_i32_0 = arith.constant 0 : i32
    return %c0_i32, %arg1 : i32, i32
  }
  func.func @transform_2(%arg0: i32, %arg1: i32) -> (i32, i32) {
    %c0_i32 = arith.constant 0 : i32
    %c0_i32_0 = arith.constant 0 : i32
    return %c0_i32, %arg1 : i32, i32
  }
  func.func @transform_3(%arg0: i32, %arg1: i32) -> (i32, i32) {
    %c0_i32 = arith.constant 0 : i32
    %c0_i32_0 = arith.constant 0 : i32
    return %c0_i32, %arg1 : i32, i32
  }
  func.func @transform_4(%arg0: i32, %arg1: i32) -> (i32, i32) {
    %c0_i32 = arith.constant 0 : i32
    %c0_i32_0 = arith.constant 0 : i32
    return %c0_i32, %arg1 : i32, i32
  }
  func.func @transform_5(%arg0: i32, %arg1: i32) -> (i32, i32) {
    %c0_i32 = arith.constant 0 : i32
    return %arg0, %arg1 : i32, i32
  }
}

module attributes {stable_mosaic.version = 11 : i64} {
  func.func @_mm_stats_kernel(%arg0: i32, %arg1: i32, %arg2: i32, %arg3: memref<512x256xbf16, #tpu.memory_space<vmem>>, %arg4: memref<256x128xbf16, #tpu.memory_space<vmem>>, %arg5: memref<512x128xbf16, #tpu.memory_space<vmem>>, %arg6: memref<1x8x128xf32, #tpu.memory_space<vmem>>, %arg7: memref<1x8x128xf32, #tpu.memory_space<vmem>>, %arg8: memref<512x128xf32, #tpu.memory_space<vmem>>) attributes {dimension_semantics = [#tpu.dimension_semantics<parallel>, #tpu.dimension_semantics<parallel>, #tpu.dimension_semantics<arbitrary>], iteration_bounds = array<i64: 1, 1, 1>, scalar_prefetch = 0 : i64, scratch_operands = 1 : i64, tpu.core_type = #tpu.core_type<tc>, window_params = [{transform_indices = @transform_0, window_bounds = array<i64: 512, 256>}, {transform_indices = @transform_1, window_bounds = array<i64: 256, 128>}, {transform_indices = @transform_2, window_bounds = array<i64: 512, 128>}, {transform_indices = @transform_3, window_bounds = array<i64: 1, 8, 128>}, {transform_indices = @transform_4, window_bounds = array<i64: 1, 8, 128>}]} {
    %c0_i32 = arith.constant 0 : i32
    %0 = arith.cmpi eq, %arg2, %c0_i32 : i32
    %1 = arith.extui %0 : i1 to i32
    %c0_i32_0 = arith.constant 0 : i32
    %2 = arith.cmpi ne, %1, %c0_i32_0 : i32
    scf.if %2 {
      %cst_10 = arith.constant 0.000000e+00 : f32
      %12 = vector.broadcast %cst_10 : f32 to vector<512x128xf32>
      %c0_11 = arith.constant 0 : index
      %c0_12 = arith.constant 0 : index
      %13 = vector.load %arg8[%c0_11, %c0_12] : memref<512x128xf32, #tpu.memory_space<vmem>>, vector<512x128xf32>
      tpu.vector_store %arg8[%c0_11, %c0_12], %12 {strides = array<i32>} : memref<512x128xf32, #tpu.memory_space<vmem>>, vector<512x128xf32>,
    } else {
    }
    %c0 = arith.constant 0 : index
    %c0_1 = arith.constant 0 : index
    %3 = vector.load %arg8[%c0, %c0_1] : memref<512x128xf32, #tpu.memory_space<vmem>>, vector<512x128xf32>
    %c0_2 = arith.constant 0 : index
    %c0_3 = arith.constant 0 : index
    %4 = vector.load %arg3[%c0_2, %c0_3] : memref<512x256xbf16, #tpu.memory_space<vmem>>, vector<512x256xbf16>
    %c0_4 = arith.constant 0 : index
    %c0_5 = arith.constant 0 : index
    %5 = vector.load %arg4[%c0_4, %c0_5] : memref<256x128xbf16, #tpu.memory_space<vmem>>, vector<256x128xbf16>
    %cst = arith.constant dense<0.000000e+00> : vector<512x128xf32>
    %6 = tpu.matmul %4, %5, %cst {dimension_numbers = #tpu.dot_dimension_numbers<[1], [0], [0], [1], [0, 0, 1, 1], [], []>} : vector<512x256xbf16>, vector<256x128xbf16>, vector<512x128xf32> -> vector<512x128xf32>
    %7 = arith.addf %3, %6 : vector<512x128xf32>
    %c0_6 = arith.constant 0 : index
    %c0_7 = arith.constant 0 : index
    %8 = vector.load %arg8[%c0_6, %c0_7] : memref<512x128xf32, #tpu.memory_space<vmem>>, vector<512x128xf32>
    tpu.vector_store %arg8[%c0_6, %c0_7], %7 {strides = array<i32>} : memref<512x128xf32, #tpu.memory_space<vmem>>, vector<512x128xf32>,
    %c0_i32_8 = arith.constant 0 : i32
    %9 = arith.cmpi eq, %arg2, %c0_i32_8 : i32
    %10 = arith.extui %9 : i1 to i32
    %c0_i32_9 = arith.constant 0 : i32
    %11 = arith.cmpi ne, %10, %c0_i32_9 : i32
    scf.if %11 {
      %c0_10 = arith.constant 0 : index
      %c0_11 = arith.constant 0 : index
      %12 = vector.load %arg8[%c0_10, %c0_11] : memref<512x128xf32, #tpu.memory_space<vmem>>, vector<512x128xf32>
      %13 = arith.truncf %12 : vector<512x128xf32> to vector<512x128xbf16>
      %c0_12 = arith.constant 0 : index
      %c0_13 = arith.constant 0 : index
      %14 = vector.load %arg5[%c0_12, %c0_13] : memref<512x128xbf16, #tpu.memory_space<vmem>>, vector<512x128xbf16>
      tpu.vector_store %arg5[%c0_12, %c0_13], %13 {strides = array<i32>} : memref<512x128xbf16, #tpu.memory_space<vmem>>, vector<512x128xbf16>,
      %15 = vector.shape_cast %12 : vector<512x128xf32> to vector<64x8x128xf32>
      %cst_14 = arith.constant dense<0.000000e+00> : vector<8x128xf32>
      %16 = vector.multi_reduction <add>, %15, %cst_14 [0] : vector<64x8x128xf32> to vector<8x128xf32>
      %c0_15 = arith.constant 0 : index
      %c0_16 = arith.constant 0 : index
      %c0_17 = arith.constant 0 : index
      %17 = vector.load %arg6[%c0_15, %c0_16, %c0_17] : memref<1x8x128xf32, #tpu.memory_space<vmem>>, vector<1x8x128xf32>
      %18 = vector.shape_cast %17 : vector<1x8x128xf32> to vector<8x128xf32>
      %19 = vector.shape_cast %16 : vector<8x128xf32> to vector<1x8x128xf32>
      tpu.vector_store %arg6[%c0_15, %c0_16, %c0_17], %19 {strides = array<i32>} : memref<1x8x128xf32, #tpu.memory_space<vmem>>, vector<1x8x128xf32>,
      %20 = arith.mulf %15, %15 : vector<64x8x128xf32>
      %cst_18 = arith.constant dense<0.000000e+00> : vector<8x128xf32>
      %21 = vector.multi_reduction <add>, %20, %cst_18 [0] : vector<64x8x128xf32> to vector<8x128xf32>
      %c0_19 = arith.constant 0 : index
      %c0_20 = arith.constant 0 : index
      %c0_21 = arith.constant 0 : index
      %22 = vector.load %arg7[%c0_19, %c0_20, %c0_21] : memref<1x8x128xf32, #tpu.memory_space<vmem>>, vector<1x8x128xf32>
      %23 = vector.shape_cast %22 : vector<1x8x128xf32> to vector<8x128xf32>
      %24 = vector.shape_cast %21 : vector<8x128xf32> to vector<1x8x128xf32>
      tpu.vector_store %arg7[%c0_19, %c0_20, %c0_21], %24 {strides = array<i32>} : memref<1x8x128xf32, #tpu.memory_space<vmem>>, vector<1x8x128xf32>,
    } else {
    }
    return
  }
  func.func @transform_0(%arg0: i32, %arg1: i32, %arg2: i32) -> (i32, i32) {
    %c0_i32 = arith.constant 0 : i32
    return %arg1, %arg2 : i32, i32
  }
  func.func @transform_1(%arg0: i32, %arg1: i32, %arg2: i32) -> (i32, i32) {
    %c0_i32 = arith.constant 0 : i32
    return %arg2, %arg0 : i32, i32
  }
  func.func @transform_2(%arg0: i32, %arg1: i32, %arg2: i32) -> (i32, i32) {
    %c0_i32 = arith.constant 0 : i32
    return %arg1, %arg0 : i32, i32
  }
  func.func @transform_3(%arg0: i32, %arg1: i32, %arg2: i32) -> (i32, i32, i32) {
    %c0_i32 = arith.constant 0 : i32
    %c0_i32_0 = arith.constant 0 : i32
    return %arg1, %c0_i32, %arg0 : i32, i32, i32
  }
  func.func @transform_4(%arg0: i32, %arg1: i32, %arg2: i32) -> (i32, i32, i32) {
    %c0_i32 = arith.constant 0 : i32
    %c0_i32_0 = arith.constant 0 : i32
    return %arg1, %c0_i32, %arg0 : i32, i32, i32
  }
}

</mosaic_0001>

<bundles_post_ra>
// kernel: f.3
= control target key start
LH: loop header
LB: loop body
LE: loop exit
PB: predicated region body
PF: predicated region fallthrough
CT: control target
= control target key end

     0   :  { %v157_v3 = vlaneseq  ;;  %s1912_s0 = inlined_call_operand.vmem [shape: bf16[512,128], index: 0, kind: input, shape index: {}]   ;;  %s1913_s1 = inlined_call_operand.vmem [shape: f32[1,128], index: 1, kind: input, shape index: {}]   ;;  %s1914_s2 = inlined_call_operand.vmem [shape: f32[1,128], index: 2, kind: input, shape index: {}]   ;;  %s1915_s3 = inlined_call_operand.vmem [shape: f32[1,128], index: 3, kind: input, shape index: {}]   ;;  %s1916_s4 = inlined_call_operand.vmem [shape: f32[1,128], index: 4, kind: input, shape index: {}]   ;;  %s1917_s5 = inlined_call_operand.hbm [shape: bf16[512,128], index: 5, kind: output, shape index: {}]  }
   0x1   :  { %v971_v0 = vld [vmem:[%s1912_s0] sm:$0xff]   ;;  %v1258_v9 = vld [vmem:[%s1912_s0 + $0x8] sm:$0xff]   ;;  %v1259_v10 = vld [vmem:[%s1912_s0 + $0x10] sm:$0xff]  }
   0x2   :  { %v149_v1 = vld [vmem:[%s1913_s1] sm:$0x1]  ;;  %v972_v6 = vunpack.c.l.bf16 %v971_v0  ;;  %v973_v7 = vunpack.c.h.bf16 %v971_v0  ;;  %v1389_v8 = vshrl.u32 %v157_v3, 7  ;;  %v1260_v11 = vld [vmem:[%s1912_s0 + $0x18] sm:$0xff]   ;;  %v976_v13 = vunpack.c.l.bf16 %v1258_v9  ;;  %v1262_v17 = vld [vmem:[%s1912_s0 + $0x28] sm:$0xff]  }
   0x3   :  { %v151_v2 = vld [vmem:[%s1914_s2] sm:$0x1]  ;;  %v150_v4 = vmul.f32 0.001953125, %v149_v1  ;;  %v977_v14 = vunpack.c.h.bf16 %v1258_v9  ;;  %v980_v15 = vunpack.c.l.bf16 %v1259_v10  ;;  %v1263_v18 = vld [vmem:[%s1912_s0 + $0x30] sm:$0xff]   ;;  %v981_v20 = vunpack.c.h.bf16 %v1259_v10  ;;  %v1264_v23 = vld [vmem:[%s1912_s0 + $0x38] sm:$0xff]  }
   0x4   :  { %v152_v5 = vmul.f32 0.001953125, %v151_v2  ;;  %v1261_v16 = vld [vmem:[%s1912_s0 + $0x20] sm:$0xff]   ;;  %v159_v19 = vsub.s32 0, %v1389_v8  ;;  %v984_v21 = vunpack.c.l.bf16 %v1260_v11  ;;  %v985_v22 = vunpack.c.h.bf16 %v1260_v11  ;;  %v1266_v49 = vld [vmem:[%s1912_s0 + $0x48] sm:$0xff]   ;;  %v1267_v50 = vld [vmem:[%s1912_s0 + $0x50] sm:$0xff]  }
   0x5   :  { %v153_v12 = vmul.f32 %v150_v4, %v150_v4  ;;  %v1265_v24 = vld [vmem:[%s1912_s0 + $0x40] sm:$0xff]   ;;  %v988_v26 = vunpack.c.l.bf16 %v1261_v16  ;;  %v989_v27 = vunpack.c.h.bf16 %v1261_v16  ;;  %v992_v28 = vunpack.c.l.bf16 %v1262_v17  ;;  %v1268_v54 = vld [vmem:[%s1912_s0 + $0x58] sm:$0xff]  }
   0x6   :  { %v1418_v29 = vrot.slane %v150_v4, %v159_v19  ;;  %v993_v30 = vunpack.c.h.bf16 %v1262_v17  ;;  %v996_v31 = vunpack.c.l.bf16 %v1263_v18  ;;  %v997_v32 = vunpack.c.h.bf16 %v1263_v18  ;;  %v1269_v55 = vld [vmem:[%s1912_s0 + $0x60] sm:$0xff]  }
   0x7   :  { %v154_v25 = vsub.f32 %v152_v5, %v153_v12  ;;  %v1000_v34 = vunpack.c.l.bf16 %v1264_v23  ;;  %v1001_v35 = vunpack.c.h.bf16 %v1264_v23  ;;  %v1004_v36 = vunpack.c.l.bf16 %v1265_v24 }
   0x8   :  { %v1421_v37 = vsub.f32 %v972_v6, %v1418_v29  ;;  %v1424_v38 = vsub.f32 %v973_v7, %v1418_v29  ;;  %v1427_v39 = vsub.f32 %v976_v13, %v1418_v29  ;;  %v1430_v40 = vsub.f32 %v977_v14, %v1418_v29 }
   0x9   :  { %v155_v33 = vmax.f32 %v154_v25, 0.0  ;;  %v1433_v42 = vsub.f32 %v980_v15, %v1418_v29  ;;  %v1436_v43 = vsub.f32 %v981_v20, %v1418_v29  ;;  %v1439_v44 = vsub.f32 %v984_v21, %v1418_v29 }
   0xa   :  { %v1442_v45 = vsub.f32 %v985_v22, %v1418_v29  ;;  %v1445_v46 = vsub.f32 %v988_v26, %v1418_v29  ;;  %v1448_v47 = vsub.f32 %v989_v27, %v1418_v29  ;;  %v1451_v48 = vsub.f32 %v992_v28, %v1418_v29 }
   0xb   :  { %v226_v41 = vadd.f32 1e-05, %v155_v33  ;;  %v1460_v51 = vsub.f32 %v993_v30, %v1418_v29  ;;  %v1463_v52 = vsub.f32 %v996_v31, %v1418_v29  ;;  %v1466_v53 = vsub.f32 %v997_v32, %v1418_v29 }
   0xc   :  { %v1475_v56 = vsub.f32 %v1000_v34, %v1418_v29  ;;  %v1478_v57 = vsub.f32 %v1001_v35, %v1418_v29  ;;  %v1005_v58 = vunpack.c.h.bf16 %v1265_v24  ;;  %v1481_v59 = vsub.f32 %v1004_v36, %v1418_v29 }
   0xd   :  { %1323 = vrsqrt.f32 %v226_v41 }
   0xe   :  { %10 = vsyncpa [#allocation3], 0  ;;  %v1008_v60 = vunpack.c.l.bf16 %v1266_v49  ;;  %v1009_v61 = vunpack.c.h.bf16 %v1266_v49  ;;  %v1012_v62 = vunpack.c.l.bf16 %v1267_v50  ;;  %v1013_v63 = vunpack.c.h.bf16 %v1267_v50  ;;  %v1270_v4 = vld [vmem:[%s1912_s0 + $0x68] sm:$0xff]   ;;  %v1271_v5 = vld [vmem:[%s1912_s0 + $0x70] sm:$0xff]  }
   0xf   :  { %v1484_v0 = vsub.f32 %v1005_v58, %v1418_v29  ;;  %v1016_v1 = vunpack.c.l.bf16 %v1268_v54  ;;  %v1017_v2 = vunpack.c.h.bf16 %v1268_v54  ;;  %v1020_v3 = vunpack.c.l.bf16 %v1269_v55  ;;  %v1272_v11 = vld [vmem:[%s1912_s0 + $0x78] sm:$0xff]   ;;  %v1273_v12 = vld [vmem:[%s1912_s0 + $0x80] sm:$0xff]   ;;  %v1274_v26 = vld [vmem:[%s1912_s0 + $0x88] sm:$0xff]  }
  0x10   :  { %v1493_v6 = vsub.f32 %v1008_v60, %v1418_v29  ;;  %v1496_v7 = vsub.f32 %v1009_v61, %v1418_v29  ;;  %v1499_v9 = vsub.f32 %v1012_v62, %v1418_v29  ;;  %v1502_v10 = vsub.f32 %v1013_v63, %v1418_v29  ;;  %v1275_v27 = vld [vmem:[%s1912_s0 + $0x90] sm:$0xff]   ;;  %v1276_v33 = vld [vmem:[%s1912_s0 + $0x98] sm:$0xff]   ;;  %v1277_v34 = vld [vmem:[%s1912_s0 + $0xa0] sm:$0xff]  }
  0x11   :  { %v1511_v13 = vsub.f32 %v1016_v1, %v1418_v29  ;;  %v1514_v14 = vsub.f32 %v1017_v2, %v1418_v29  ;;  %v1021_v15 = vunpack.c.h.bf16 %v1269_v55  ;;  %v1517_v16 = vsub.f32 %v1020_v3, %v1418_v29  ;;  %v1561_v1 = vld [vmem:[%s1912_s0 + $0xa8] sm:$0xff]   ;;  %v1566_v2 = vld [vmem:[%s1912_s0 + $0xb0] sm:$0xff]  }
  0x12   :  { %v1024_v17 = vunpack.c.l.bf16 %v1270_v4  ;;  %v1025_v18 = vunpack.c.h.bf16 %v1270_v4  ;;  %v1028_v20 = vunpack.c.l.bf16 %v1271_v5  ;;  %v1029_v21 = vunpack.c.h.bf16 %v1271_v5 }
  0x13   :  { %v1520_v22 = vsub.f32 %v1021_v15, %v1418_v29  ;;  %v1032_v23 = vunpack.c.l.bf16 %v1272_v11  ;;  %v1033_v24 = vunpack.c.h.bf16 %v1272_v11  ;;  %v1036_v25 = vunpack.c.l.bf16 %v1273_v12 }
  0x14   :  { %v1529_v28 = vsub.f32 %v1024_v17, %v1418_v29  ;;  %v1532_v30 = vsub.f32 %v1025_v18, %v1418_v29  ;;  %v1535_v31 = vsub.f32 %v1028_v20, %v1418_v29  ;;  %v1538_v32 = vsub.f32 %v1029_v21, %v1418_v29 }
  0x15   :  { %v1547_v35 = vsub.f32 %v1032_v23, %v1418_v29  ;;  %v1550_v36 = vsub.f32 %v1033_v24, %v1418_v29  ;;  %v1037_v41 = vunpack.c.h.bf16 %v1273_v12  ;;  %v1553_v49 = vsub.f32 %v1036_v25, %v1418_v29  ;;  %v1583_v12 = vld [vmem:[%s1912_s0 + $0xb8] sm:$0xff]  }
  0x16   :  { %v1040_v50 = vunpack.c.l.bf16 %v1274_v26  ;;  %v1041_v54 = vunpack.c.h.bf16 %v1274_v26  ;;  %v1044_v55 = vunpack.c.l.bf16 %v1275_v27  ;;  %v1045_v58 = vunpack.c.h.bf16 %v1275_v27  ;;  %v1604_v27 = vld [vmem:[%s1915_s3] ss:$0 sm:$0xff] }
  0x17   :  { %v1556_v60 = vsub.f32 %v1037_v41, %v1418_v29  ;;  %v1048_v61 = vunpack.c.l.bf16 %v1276_v33  ;;  %v1049_v62 = vunpack.c.h.bf16 %v1276_v33  ;;  %v1052_v63 = vunpack.c.l.bf16 %v1277_v34 }
  0x18   :  { %v1569_v3 = vsub.f32 %v1040_v50, %v1418_v29  ;;  %v1572_v4 = vsub.f32 %v1041_v54, %v1418_v29  ;;  %v1575_v5 = vsub.f32 %v1044_v55, %v1418_v29  ;;  %v1578_v11 = vsub.f32 %v1045_v58, %v1418_v29  ;;  %v1623_v58 = vld [vmem:[%s1916_s4] ss:$0 sm:$0xff] }
  0x19   :  { %v1586_v17 = vsub.f32 %v1048_v61, %v1418_v29  ;;  %v1589_v18 = vsub.f32 %v1049_v62, %v1418_v29  ;;  %v1053_v20 = vunpack.c.h.bf16 %v1277_v34  ;;  %v1592_v21 = vsub.f32 %v1052_v63, %v1418_v29 }
  0x1a   :  { %v1324_v15 = vpop.eup %1323 }
  0x1b   :  { %v1596_v23 = vrot.slane %v1324_v15, %v159_v19  ;;  %v1607_v33 = vsub.f32 %v1053_v20, %v1418_v29 }
  0x1d   :  { %v234_v41 = vmul.f32 %v1596_v23, %v1421_v37  ;;  %v235_v50 = vmul.f32 %v1596_v23, %v1424_v38  ;;  %v236_v54 = vmul.f32 %v1596_v23, %v1427_v39  ;;  %v237_v55 = vmul.f32 %v1596_v23, %v1430_v40 }
  0x1e   :  { %v238_v61 = vmul.f32 %v1596_v23, %v1433_v42  ;;  %v239_v37 = vmul.f32 %v1596_v23, %v1436_v43  ;;  %v240_v38 = vmul.f32 %v1596_v23, %v1439_v44  ;;  %v241_v39 = vmul.f32 %v1596_v23, %v1442_v45 }
  0x1f   :  { %v305_v62 = vmul.f32 %v1604_v27, %v234_v41  ;;  %v306_v40 = vmul.f32 %v1604_v27, %v235_v50  ;;  %v307_v63 = vmul.f32 %v1604_v27, %v236_v54  ;;  %v308_v15 = vmul.f32 %v1604_v27, %v237_v55 }
  0x20   :  { %v309_v20 = vmul.f32 %v1604_v27, %v238_v61  ;;  %v310_v42 = vmul.f32 %v1604_v27, %v239_v37  ;;  %v311_v43 = vmul.f32 %v1604_v27, %v240_v38  ;;  %v312_v19 = vmul.f32 %v1604_v27, %v241_v39 }
  0x21   :  { %v376_v44 = vadd.f32 %v1623_v58, %v305_v62  ;;  %v377_v45 = vadd.f32 %v1623_v58, %v306_v40  ;;  %v378_v41 = vadd.f32 %v1623_v58, %v307_v63  ;;  %v379_v50 = vadd.f32 %v1623_v58, %v308_v15 }
  0x22   :  { %v380_v54 = vadd.f32 %v1623_v58, %v309_v20  ;;  %v381_v55 = vadd.f32 %v1623_v58, %v310_v42  ;;  %v382_v61 = vadd.f32 %v1623_v58, %v311_v43  ;;  %v383_v37 = vadd.f32 %v1623_v58, %v312_v19 }
  0x23   :  { %v440_v8 = vmax.f32 %v376_v44, 0.0  ;;  %v441_v38 = vmax.f32 %v377_v45, 0.0  ;;  %v442_v34 = vmax.f32 %v378_v41, 0.0  ;;  %v443_v39 = vmax.f32 %v379_v50, 0.0 }
  0x24   :  { %v444_v26 = vmax.f32 %v380_v54, 0.0  ;;  %v445_v62 = vmax.f32 %v381_v55, 0.0  ;;  %v446_v25 = vmax.f32 %v382_v61, 0.0  ;;  %v447_v40 = vmax.f32 %v383_v37, 0.0 }
  0x25   :  { %v1101_v24 = vpack.c.bf16 %v441_v38, %v440_v8  ;;  %v1106_v63 = vpack.c.bf16 %v443_v39, %v442_v34  ;;  %v242_v15 = vmul.f32 %v1596_v23, %v1445_v46  ;;  %v243_v20 = vmul.f32 %v1596_v23, %v1448_v47 }
  0x26   :  { %v1111_v42 = vpack.c.bf16 %v445_v62, %v444_v26  ;;  %v1116_v43 = vpack.c.bf16 %v447_v40, %v446_v25  ;;  %v244_v19 = vmul.f32 %v1596_v23, %v1451_v48  ;;  %v245_v44 = vmul.f32 %v1596_v23, %v1460_v51 }
  0x27   :  { %1102 = vst [vmem:[#allocation2] sm:$0xff] %v1101_v24   ;;  %1289 = vst [vmem:[#allocation2 + $0x8] sm:$0xff] %v1106_v63   ;;  %v313_v45 = vmul.f32 %v1604_v27, %v242_v15  ;;  %v314_v34 = vmul.f32 %v1604_v27, %v243_v20  ;;  %v246_v46 = vmul.f32 %v1596_v23, %v1463_v52 }
  0x28   :  { %v247_v47 = vmul.f32 %v1596_v23, %v1466_v53  ;;  %1290 = vst [vmem:[#allocation2 + $0x10] sm:$0xff] %v1111_v42   ;;  %1291 = vst [vmem:[#allocation2 + $0x18] sm:$0xff] %v1116_v43   ;;  %v315_v25 = vmul.f32 %v1604_v27, %v244_v19  ;;  %v316_v48 = vmul.f32 %v1604_v27, %v245_v44 }
  0x29   :  { %v248_v51 = vmul.f32 %v1596_v23, %v1475_v56  ;;  %v249_v24 = vmul.f32 %v1596_v23, %v1478_v57  ;;  %v384_v26 = vadd.f32 %v1623_v58, %v313_v45  ;;  %v385_v8 = vadd.f32 %v1623_v58, %v314_v34 }
  0x2a   :  { %v317_v52 = vmul.f32 %v1604_v27, %v246_v46  ;;  %v318_v53 = vmul.f32 %v1604_v27, %v247_v47  ;;  %v386_v41 = vadd.f32 %v1623_v58, %v315_v25  ;;  %v387_v50 = vadd.f32 %v1623_v58, %v316_v48 }
  0x2b   :  { %v319_v54 = vmul.f32 %v1604_v27, %v248_v51  ;;  %v320_v55 = vmul.f32 %v1604_v27, %v249_v24  ;;  %v448_v56 = vmax.f32 %v384_v26, 0.0  ;;  %v449_v61 = vmax.f32 %v385_v8, 0.0 }
  0x2c   :  { %v388_v57 = vadd.f32 %v1623_v58, %v317_v52  ;;  %v389_v37 = vadd.f32 %v1623_v58, %v318_v53  ;;  %v450_v38 = vmax.f32 %v386_v41, 0.0  ;;  %v451_v39 = vmax.f32 %v387_v50, 0.0 }
  0x2d   :  { %v390_v62 = vadd.f32 %v1623_v58, %v319_v54  ;;  %v391_v40 = vadd.f32 %v1623_v58, %v320_v55  ;;  %v1121_v63 = vpack.c.bf16 %v449_v61, %v448_v56  ;;  %v250_v42 = vmul.f32 %v1596_v23, %v1481_v59 }
  0x2e   :  { %v452_v15 = vmax.f32 %v388_v57, 0.0  ;;  %v453_v20 = vmax.f32 %v389_v37, 0.0  ;;  %v1126_v43 = vpack.c.bf16 %v451_v39, %v450_v38  ;;  %v251_v45 = vmul.f32 %v1596_v23, %v1484_v0 }
  0x2f   :  { %v454_v19 = vmax.f32 %v390_v62, 0.0  ;;  %v455_v44 = vmax.f32 %v391_v40, 0.0  ;;  %1292 = vst [vmem:[#allocation2 + $0x20] sm:$0xff] %v1121_v63   ;;  %v321_v46 = vmul.f32 %v1604_v27, %v250_v42  ;;  %v252_v47 = vmul.f32 %v1596_v23, %v1493_v6 }
  0x30   :  { %v1131_v34 = vpack.c.bf16 %v453_v20, %v452_v15  ;;  %v253_v25 = vmul.f32 %v1596_v23, %v1496_v7  ;;  %1293 = vst [vmem:[#allocation2 + $0x28] sm:$0xff] %v1126_v43   ;;  %v322_v59 = vmul.f32 %v1604_v27, %v251_v45  ;;  %v254_v51 = vmul.f32 %v1596_v23, %v1499_v9 }
  0x31   :  { %v1136_v48 = vpack.c.bf16 %v455_v44, %v454_v19  ;;  %v255_v0 = vmul.f32 %v1596_v23, %v1502_v10  ;;  %v392_v24 = vadd.f32 %v1623_v58, %v321_v46  ;;  %v323_v26 = vmul.f32 %v1604_v27, %v252_v47 }
  0x32   :  { %1294 = vst [vmem:[#allocation2 + $0x30] sm:$0xff] %v1131_v34   ;;  %v324_v6 = vmul.f32 %v1604_v27, %v253_v25  ;;  %v256_v7 = vmul.f32 %v1596_v23, %v1511_v13  ;;  %v393_v8 = vadd.f32 %v1623_v58, %v322_v59  ;;  %v325_v52 = vmul.f32 %v1604_v27, %v254_v51 }
  0x33   :  { %1295 = vst [vmem:[#allocation2 + $0x38] sm:$0xff] %v1136_v48   ;;  %v326_v9 = vmul.f32 %v1604_v27, %v255_v0  ;;  %v257_v10 = vmul.f32 %v1596_v23, %v1514_v14  ;;  %v456_v53 = vmax.f32 %v392_v24, 0.0  ;;  %v394_v41 = vadd.f32 %v1623_v58, %v323_v26 }
  0x34   :  { %v395_v50 = vadd.f32 %v1623_v58, %v324_v6  ;;  %v327_v54 = vmul.f32 %v1604_v27, %v256_v7  ;;  %v457_v55 = vmax.f32 %v393_v8, 0.0  ;;  %v396_v13 = vadd.f32 %v1623_v58, %v325_v52 }
  0x35   :  { %v397_v56 = vadd.f32 %v1623_v58, %v326_v9  ;;  %v328_v61 = vmul.f32 %v1604_v27, %v257_v10  ;;  %v458_v57 = vmax.f32 %v394_v41, 0.0  ;;  %v258_v14 = vmul.f32 %v1596_v23, %v1517_v16 }
  0x36   :  { %v459_v37 = vmax.f32 %v395_v50, 0.0  ;;  %v398_v38 = vadd.f32 %v1623_v58, %v327_v54  ;;  %v1141_v39 = vpack.c.bf16 %v457_v55, %v456_v53  ;;  %v460_v62 = vmax.f32 %v396_v13, 0.0 }
  0x37   :  { %v461_v40 = vmax.f32 %v397_v56, 0.0  ;;  %v399_v63 = vadd.f32 %v1623_v58, %v328_v61  ;;  %v259_v42 = vmul.f32 %v1596_v23, %v1520_v22  ;;  %v329_v43 = vmul.f32 %v1604_v27, %v258_v14 }
  0x38   :  { %v1146_v15 = vpack.c.bf16 %v459_v37, %v458_v57  ;;  %v462_v20 = vmax.f32 %v398_v38, 0.0  ;;  %1296 = vst [vmem:[#allocation2 + $0x40] sm:$0xff] %v1141_v39   ;;  %v260_v45 = vmul.f32 %v1596_v23, %v1529_v28  ;;  %v261_v16 = vmul.f32 %v1596_v23, %v1532_v30 }
  0x39   :  { %v1151_v19 = vpack.c.bf16 %v461_v40, %v460_v62  ;;  %v463_v44 = vmax.f32 %v399_v63, 0.0  ;;  %v330_v34 = vmul.f32 %v1604_v27, %v259_v42  ;;  %v400_v46 = vadd.f32 %v1623_v58, %v329_v43 }
  0x3a   :  { %1297 = vst [vmem:[#allocation2 + $0x48] sm:$0xff] %v1146_v15   ;;  %v262_v47 = vmul.f32 %v1596_v23, %v1535_v31  ;;  %v263_v22 = vmul.f32 %v1596_v23, %v1538_v32  ;;  %v331_v48 = vmul.f32 %v1604_v27, %v260_v45  ;;  %v332_v28 = vmul.f32 %v1604_v27, %v261_v16 }
  0x3b   :  { %1298 = vst [vmem:[#allocation2 + $0x50] sm:$0xff] %v1151_v19   ;;  %v1156_v25 = vpack.c.bf16 %v463_v44, %v462_v20  ;;  %v264_v30 = vmul.f32 %v1596_v23, %v1547_v35  ;;  %v401_v59 = vadd.f32 %v1623_v58, %v330_v34  ;;  %v464_v51 = vmax.f32 %v400_v46, 0.0 }
  0x3c   :  { %v333_v0 = vmul.f32 %v1604_v27, %v262_v47  ;;  %v334_v24 = vmul.f32 %v1604_v27, %v263_v22  ;;  %v402_v31 = vadd.f32 %v1623_v58, %v331_v48  ;;  %v403_v32 = vadd.f32 %v1623_v58, %v332_v28 }
  0x3d   :  { %1299 = vst [vmem:[#allocation2 + $0x58] sm:$0xff] %v1156_v25   ;;  %v265_v26 = vmul.f32 %v1596_v23, %v1550_v36  ;;  %v335_v6 = vmul.f32 %v1604_v27, %v264_v30  ;;  %v465_v7 = vmax.f32 %v401_v59, 0.0  ;;  %v266_v52 = vmul.f32 %v1596_v23, %v1553_v49 }
  0x3e   :  { %v404_v35 = vadd.f32 %v1623_v58, %v333_v0  ;;  %v405_v8 = vadd.f32 %v1623_v58, %v334_v24  ;;  %v466_v9 = vmax.f32 %v402_v31, 0.0  ;;  %v467_v10 = vmax.f32 %v403_v32, 0.0 }
  0x3f   :  { %v336_v53 = vmul.f32 %v1604_v27, %v265_v26  ;;  %v406_v41 = vadd.f32 %v1623_v58, %v335_v6  ;;  %v1161_v50 = vpack.c.bf16 %v465_v7, %v464_v51  ;;  %v267_v36 = vmul.f32 %v1596_v23, %v1556_v60 }
  0x40   :  { %v468_v54 = vmax.f32 %v404_v35, 0.0  ;;  %v469_v55 = vmax.f32 %v405_v8, 0.0  ;;  %v1166_v13 = vpack.c.bf16 %v467_v10, %v466_v9  ;;  %v337_v57 = vmul.f32 %v1604_v27, %v266_v52 }
  0x41   :  { %v407_v56 = vadd.f32 %v1623_v58, %v336_v53  ;;  %v470_v61 = vmax.f32 %v406_v41, 0.0  ;;  %1300 = vst [vmem:[#allocation2 + $0x60] sm:$0xff] %v1161_v50   ;;  %v338_v37 = vmul.f32 %v1604_v27, %v267_v36  ;;  %v268_v38 = vmul.f32 %v1596_v23, %v1569_v3  ;;  %v1281_v36 = vld [vmem:[%s1912_s0 + $0xc0] sm:$0xff]  }
  0x42   :  { %v1171_v49 = vpack.c.bf16 %v469_v55, %v468_v54  ;;  %v269_v14 = vmul.f32 %v1596_v23, %v1572_v4  ;;  %1301 = vst [vmem:[#allocation2 + $0x68] sm:$0xff] %v1166_v13   ;;  %v408_v60 = vadd.f32 %v1623_v58, %v337_v57  ;;  %v270_v62 = vmul.f32 %v1596_v23, %v1575_v5 }
  0x43   :  { %v471_v39 = vmax.f32 %v407_v56, 0.0  ;;  %v271_v40 = vmul.f32 %v1596_v23, %v1578_v11  ;;  %v409_v63 = vadd.f32 %v1623_v58, %v338_v37  ;;  %v339_v15 = vmul.f32 %v1604_v27, %v268_v38 }
  0x44   :  { %1302 = vst [vmem:[#allocation2 + $0x70] sm:$0xff] %v1171_v49   ;;  %v340_v3 = vmul.f32 %v1604_v27, %v269_v14  ;;  %v272_v4 = vmul.f32 %v1596_v23, %v1586_v17  ;;  %v472_v42 = vmax.f32 %v408_v60, 0.0  ;;  %v341_v43 = vmul.f32 %v1604_v27, %v270_v62 }
  0x45   :  { %v1176_v20 = vpack.c.bf16 %v471_v39, %v470_v61  ;;  %v342_v19 = vmul.f32 %v1604_v27, %v271_v40  ;;  %v473_v5 = vmax.f32 %v409_v63, 0.0  ;;  %v410_v44 = vadd.f32 %v1623_v58, %v339_v15 }
  0x46   :  { %v411_v11 = vadd.f32 %v1623_v58, %v340_v3  ;;  %v273_v45 = vmul.f32 %v1596_v23, %v1589_v18  ;;  %v412_v16 = vadd.f32 %v1623_v58, %v341_v43  ;;  %v343_v17 = vmul.f32 %v1604_v27, %v272_v4 }
  0x47   :  { %1303 = vst [vmem:[#allocation2 + $0x78] sm:$0xff] %v1176_v20   ;;  %v413_v34 = vadd.f32 %v1623_v58, %v342_v19  ;;  %v274_v46 = vmul.f32 %v1596_v23, %v1592_v21  ;;  %v1181_v47 = vpack.c.bf16 %v473_v5, %v472_v42  ;;  %v474_v22 = vmax.f32 %v410_v44, 0.0 }
  0x48   :  { %v475_v25 = vmax.f32 %v411_v11, 0.0  ;;  %v344_v48 = vmul.f32 %v1604_v27, %v273_v45  ;;  %v476_v28 = vmax.f32 %v412_v16, 0.0  ;;  %v414_v59 = vadd.f32 %v1623_v58, %v343_v17 }
  0x49   :  { %v477_v30 = vmax.f32 %v413_v34, 0.0  ;;  %v275_v18 = vmul.f32 %v1596_v23, %v1607_v33  ;;  %1304 = vst [vmem:[#allocation2 + $0x80] sm:$0xff] %v1181_v47   ;;  %v345_v24 = vmul.f32 %v1604_v27, %v274_v46  ;;  %v1918_v21 = vunpack.c.l.bf16 %v1561_v1  ;;  %v1283_v47 = vld [vmem:[%s1912_s0 + $0xd0] sm:$0xff]  }
  0x4a   :  { %v1186_v51 = vpack.c.bf16 %v475_v25, %v474_v22  ;;  %v415_v0 = vadd.f32 %v1623_v58, %v344_v48  ;;  %v478_v26 = vmax.f32 %v414_v59, 0.0  ;;  %v1919_v7 = vunpack.c.h.bf16 %v1561_v1 }
  0x4b   :  { %v204_v31 = vsub.f32 %v1918_v21, %v1418_v29  ;;  %v1191_v32 = vpack.c.bf16 %v477_v30, %v476_v28  ;;  %v346_v6 = vmul.f32 %v1604_v27, %v275_v18  ;;  %v416_v8 = vadd.f32 %v1623_v58, %v345_v24 }
  0x4c   :  { %v205_v35 = vsub.f32 %v1919_v7, %v1418_v29  ;;  %1305 = vst [vmem:[#allocation2 + $0x88] sm:$0xff] %v1186_v51   ;;  %v479_v33 = vmax.f32 %v415_v0, 0.0  ;;  %v1920_v9 = vunpack.c.l.bf16 %v1566_v2  ;;  %v1921_v50 = vunpack.c.h.bf16 %v1566_v2  ;;  %v1284_v0 = vld [vmem:[%s1912_s0 + $0xd8] sm:$0xff]  }
  0x4d   :  { %v276_v52 = vmul.f32 %v1596_v23, %v204_v31  ;;  %1306 = vst [vmem:[#allocation2 + $0x90] sm:$0xff] %v1191_v32   ;;  %v417_v53 = vadd.f32 %v1623_v58, %v346_v6  ;;  %v1922_v54 = vunpack.c.l.bf16 %v1583_v12  ;;  %v480_v56 = vmax.f32 %v416_v8, 0.0 }
  0x4e   :  { %v206_v10 = vsub.f32 %v1920_v9, %v1418_v29  ;;  %v277_v41 = vmul.f32 %v1596_v23, %v205_v35  ;;  %v207_v1 = vsub.f32 %v1921_v50, %v1418_v29  ;;  %v1196_v13 = vpack.c.bf16 %v479_v33, %v478_v26 }
  0x4f   :  { %v208_v55 = vsub.f32 %v1922_v54, %v1418_v29  ;;  %v347_v61 = vmul.f32 %v1604_v27, %v276_v52  ;;  %v481_v49 = vmax.f32 %v417_v53, 0.0  ;;  %v1923_v38 = vunpack.c.h.bf16 %v1583_v12  ;;  %v1282_v12 = vld [vmem:[%s1912_s0 + $0xc8] sm:$0xff]  }
  0x50   :  { %v278_v57 = vmul.f32 %v1596_v23, %v206_v10  ;;  %v348_v37 = vmul.f32 %v1604_v27, %v277_v41  ;;  %v279_v2 = vmul.f32 %v1596_v23, %v207_v1  ;;  %1307 = vst [vmem:[#allocation2 + $0x98] sm:$0xff] %v1196_v13   ;;  %v1068_v40 = vunpack.c.l.bf16 %v1281_v36  ;;  %v1285_v1 = vld [vmem:[%s1912_s0 + $0xe0] sm:$0xff]  }
  0x51   :  { %v209_v14 = vsub.f32 %v1923_v38, %v1418_v29  ;;  %v418_v39 = vadd.f32 %v1623_v58, %v347_v61  ;;  %v280_v62 = vmul.f32 %v1596_v23, %v208_v55  ;;  %v1201_v63 = vpack.c.bf16 %v481_v49, %v480_v56 }
  0x52   :  { %v349_v60 = vmul.f32 %v1604_v27, %v278_v57  ;;  %v419_v15 = vadd.f32 %v1623_v58, %v348_v37  ;;  %v350_v3 = vmul.f32 %v1604_v27, %v279_v2  ;;  %v1069_v19 = vunpack.c.h.bf16 %v1281_v36 }
  0x53   :  { %v281_v4 = vmul.f32 %v1596_v23, %v209_v14  ;;  %v482_v20 = vmax.f32 %v418_v39, 0.0  ;;  %v351_v43 = vmul.f32 %v1604_v27, %v280_v62  ;;  %1308 = vst [vmem:[#allocation2 + $0xa0] sm:$0xff] %v1201_v63   ;;  %v210_v45 = vsub.f32 %v1068_v40, %v1418_v29  ;;  %v1286_v39 = vld [vmem:[%s1912_s0 + $0xe8] sm:$0xff]  }
  0x54   :  { %v420_v42 = vadd.f32 %v1623_v58, %v349_v60  ;;  %v483_v5 = vmax.f32 %v419_v15, 0.0  ;;  %v421_v44 = vadd.f32 %v1623_v58, %v350_v3  ;;  %v211_v17 = vsub.f32 %v1069_v19, %v1418_v29 }
  0x55   :  { %v352_v11 = vmul.f32 %v1604_v27, %v281_v4  ;;  %v422_v34 = vadd.f32 %v1623_v58, %v351_v43  ;;  %v1072_v46 = vunpack.c.l.bf16 %v1282_v12  ;;  %v282_v28 = vmul.f32 %v1596_v23, %v210_v45 }
  0x56   :  { %v484_v16 = vmax.f32 %v420_v42, 0.0  ;;  %v1206_v22 = vpack.c.bf16 %v483_v5, %v482_v20  ;;  %v485_v25 = vmax.f32 %v421_v44, 0.0  ;;  %v283_v59 = vmul.f32 %v1596_v23, %v211_v17 }
  0x57   :  { %v423_v48 = vadd.f32 %v1623_v58, %v352_v11  ;;  %v486_v30 = vmax.f32 %v422_v34, 0.0  ;;  %v1073_v18 = vunpack.c.h.bf16 %v1282_v12  ;;  %v212_v51 = vsub.f32 %v1072_v46, %v1418_v29 }
  0x58   :  { %1309 = vst [vmem:[#allocation2 + $0xa8] sm:$0xff] %v1206_v22   ;;  %v1211_v24 = vpack.c.bf16 %v485_v25, %v484_v16  ;;  %v353_v31 = vmul.f32 %v1604_v27, %v282_v28  ;;  %v1076_v32 = vunpack.c.l.bf16 %v1283_v47  ;;  %v354_v26 = vmul.f32 %v1604_v27, %v283_v59  ;;  %v1287_v16 = vld [vmem:[%s1912_s0 + $0xf0] sm:$0xff]  }
  0x59   :  { %v487_v21 = vmax.f32 %v423_v48, 0.0  ;;  %v213_v6 = vsub.f32 %v1073_v18, %v1418_v29  ;;  %v284_v7 = vmul.f32 %v1596_v23, %v212_v51  ;;  %v1077_v35 = vunpack.c.h.bf16 %v1283_v47 }
  0x5a   :  { %1310 = vst [vmem:[#allocation2 + $0xb0] sm:$0xff] %v1211_v24   ;;  %v424_v8 = vadd.f32 %v1623_v58, %v353_v31  ;;  %v214_v52 = vsub.f32 %v1076_v32, %v1418_v29  ;;  %v1080_v9 = vunpack.c.l.bf16 %v1284_v0  ;;  %v425_v10 = vadd.f32 %v1623_v58, %v354_v26 }
  0x5b   :  { %v1216_v33 = vpack.c.bf16 %v487_v21, %v486_v30  ;;  %v285_v53 = vmul.f32 %v1596_v23, %v213_v6  ;;  %v355_v41 = vmul.f32 %v1604_v27, %v284_v7  ;;  %v215_v50 = vsub.f32 %v1077_v35, %v1418_v29  ;;  %v1288_v30 = vld [vmem:[%s1912_s0 + $0xf8] sm:$0xff]   ;;  %s1347_s0 = smov [#allocation2]  }
  0x5c   :  { %v488_v54 = vmax.f32 %v424_v8, 0.0  ;;  %v286_v55 = vmul.f32 %v1596_v23, %v214_v52  ;;  %v1081_v36 = vunpack.c.h.bf16 %v1284_v0  ;;  %v216_v13 = vsub.f32 %v1080_v9, %v1418_v29  ;;  %s829_s7 = sshll.u32 %s1347_s0, 4  ;;  %s830_s7 = int_to_ptr.vmem [resolvable:$true] %s829_s7 }
  0x5d   :  { %1311 = vst [vmem:[#allocation2 + $0xb8] sm:$0xff] %v1216_v33   ;;  %v489_v56 = vmax.f32 %v425_v10, 0.0  ;;  %v356_v61 = vmul.f32 %v1604_v27, %v285_v53  ;;  %v426_v57 = vadd.f32 %v1623_v58, %v355_v41  ;;  %v287_v49 = vmul.f32 %v1596_v23, %v215_v50  ;;  %s1325_s8 = scalar_lea.vmem %s830_s7, 4096  ;;  %p1330_p1 = scmp.lt.s32.totalorder %s830_s7, %s830_s7 }
  0x5e   :  { %v357_v37 = vmul.f32 %v1604_v27, %v286_v55  ;;  %v217_v2 = vsub.f32 %v1081_v36, %v1418_v29  ;;  %v288_v38 = vmul.f32 %v1596_v23, %v216_v13  ;;  %v1084_v14 = vunpack.c.l.bf16 %v1285_v1  ;;  %p1326_p0 = scmp.ne.s32.totalorder %s830_s7, %s1325_s8  ;;  %p1331_p2 = scmp.lt.s32.totalorder %s1325_s8, %s1325_s8 }
  0x5f   :  { %v1221_v60 = vpack.c.bf16 %v489_v56, %v488_v54  ;;  %v427_v62 = vadd.f32 %v1623_v58, %v356_v61  ;;  %v490_v40 = vmax.f32 %v426_v57, 0.0  ;;  %v358_v63 = vmul.f32 %v1604_v27, %v287_v49 }
  0x60   :  { %v428_v15 = vadd.f32 %v1623_v58, %v357_v37  ;;  %v289_v3 = vmul.f32 %v1596_v23, %v217_v2  ;;  %v359_v4 = vmul.f32 %v1604_v27, %v288_v38  ;;  %v1085_v12 = vunpack.c.h.bf16 %v1285_v1  ;;  %p1332_p3 = por %p1331_p2, %p1330_p1 }
  0x61   :  { %1312 = vst [vmem:[#allocation2 + $0xc0] sm:$0xff] %v1221_v60   ;;  %v491_v20 = vmax.f32 %v427_v62, 0.0  ;;  %v429_v42 = vadd.f32 %v1623_v58, %v358_v63  ;;  %v218_v43 = vsub.f32 %v1084_v14, %v1418_v29  ;;  %v1088_v19 = vunpack.c.l.bf16 %v1286_v39 }
  0x62   :  { %v492_v5 = vmax.f32 %v428_v15, 0.0  ;;  %v360_v44 = vmul.f32 %v1604_v27, %v289_v3  ;;  %v430_v11 = vadd.f32 %v1623_v58, %v359_v4  ;;  %v219_v45 = vsub.f32 %v1085_v12, %v1418_v29  ;;  %p1333_p4 = pnand %p1332_p3, %p1326_p0 }
  0x63   :  { %v1226_v34 = vpack.c.bf16 %v491_v20, %v490_v40  ;;  %v493_v17 = vmax.f32 %v429_v42, 0.0  ;;  %v290_v46 = vmul.f32 %v1596_v23, %v218_v43  ;;  %v1089_v47 = vunpack.c.h.bf16 %v1286_v39 }
  0x64   :  { %v431_v22 = vadd.f32 %v1623_v58, %v360_v44  ;;  %v494_v25 = vmax.f32 %v430_v11, 0.0  ;;  %v291_v48 = vmul.f32 %v1596_v23, %v219_v45  ;;  %v220_v28 = vsub.f32 %v1088_v19, %v1418_v29 }
  0x65   :  { %1313 = vst [vmem:[#allocation2 + $0xc8] sm:$0xff] %v1226_v34   ;;  %v1231_v59 = vpack.c.bf16 %v493_v17, %v492_v5  ;;  %v361_v18 = vmul.f32 %v1604_v27, %v290_v46  ;;  %v221_v51 = vsub.f32 %v1089_v47, %v1418_v29  ;;  %v1092_v0 = vunpack.c.l.bf16 %v1287_v16 }
  0x66   :  { %v495_v24 = vmax.f32 %v431_v22, 0.0  ;;  %v362_v21 = vmul.f32 %v1604_v27, %v291_v48  ;;  %v292_v31 = vmul.f32 %v1596_v23, %v220_v28  ;;  %v1093_v32 = vunpack.c.h.bf16 %v1287_v16 }
  0x67   :  { %1314 = vst [vmem:[#allocation2 + $0xd0] sm:$0xff] %v1231_v59   ;;  %v432_v26 = vadd.f32 %v1623_v58, %v361_v18  ;;  %v293_v6 = vmul.f32 %v1596_v23, %v221_v51  ;;  %v222_v7 = vsub.f32 %v1092_v0, %v1418_v29  ;;  %v1096_v35 = vunpack.c.l.bf16 %v1288_v30 }
  0x68   :  { %v1236_v33 = vpack.c.bf16 %v495_v24, %v494_v25  ;;  %v433_v8 = vadd.f32 %v1623_v58, %v362_v21  ;;  %v363_v52 = vmul.f32 %v1604_v27, %v292_v31  ;;  %v223_v9 = vsub.f32 %v1093_v32, %v1418_v29 }
  0x69   :  { %v496_v10 = vmax.f32 %v432_v26, 0.0  ;;  %v364_v53 = vmul.f32 %v1604_v27, %v293_v6  ;;  %v294_v41 = vmul.f32 %v1596_v23, %v222_v7  ;;  %v1097_v50 = vunpack.c.h.bf16 %v1288_v30 }
  0x6a   :  { %1315 = vst [vmem:[#allocation2 + $0xd8] sm:$0xff] %v1236_v33   ;;  %v497_v1 = vmax.f32 %v433_v8, 0.0  ;;  %v434_v54 = vadd.f32 %v1623_v58, %v363_v52  ;;  %v295_v55 = vmul.f32 %v1596_v23, %v223_v9  ;;  %v224_v36 = vsub.f32 %v1096_v35, %v1418_v29 }
  0x6b   :  { %v435_v13 = vadd.f32 %v1623_v58, %v364_v53  ;;  %v365_v56 = vmul.f32 %v1604_v27, %v294_v41  ;;  %v225_v61 = vsub.f32 %v1097_v50, %v1418_v29 }
  0x6c   :  { %v1241_v57 = vpack.c.bf16 %v497_v1, %v496_v10  ;;  %v498_v49 = vmax.f32 %v434_v54, 0.0  ;;  %v366_v37 = vmul.f32 %v1604_v27, %v295_v55  ;;  %v296_v2 = vmul.f32 %v1596_v23, %v224_v36 }
  0x6d   :  { %v499_v38 = vmax.f32 %v435_v13, 0.0  ;;  %v436_v14 = vadd.f32 %v1623_v58, %v365_v56  ;;  %v297_v39 = vmul.f32 %v1596_v23, %v225_v61 }
  0x6e   :  { %1316 = vst [vmem:[#allocation2 + $0xe0] sm:$0xff] %v1241_v57   ;;  %v437_v60 = vadd.f32 %v1623_v58, %v366_v37  ;;  %v367_v62 = vmul.f32 %v1604_v27, %v296_v2 }
  0x6f   :  { %v1246_v40 = vpack.c.bf16 %v499_v38, %v498_v49  ;;  %v500_v63 = vmax.f32 %v436_v14, 0.0  ;;  %v368_v29 = vmul.f32 %v1604_v27, %v297_v39 }
  0x70   :  { %v501_v15 = vmax.f32 %v437_v60, 0.0  ;;  %v438_v3 = vadd.f32 %v1623_v58, %v367_v62 }
  0x71   :  { %1317 = vst [vmem:[#allocation2 + $0xe8] sm:$0xff] %v1246_v40   ;;  %v439_v4 = vadd.f32 %v1623_v58, %v368_v29 }
  0x72   :  { %v1251_v12 = vpack.c.bf16 %v501_v15, %v500_v63  ;;  %v502_v20 = vmax.f32 %v438_v3, 0.0 }
  0x73   :  { %v503_v23 = vmax.f32 %v439_v4, 0.0 }
  0x74   :  { %1318 = vst [vmem:[#allocation2 + $0xf0] sm:$0xff] %v1251_v12  }
  0x75   :  { %v1256_v42 = vpack.c.bf16 %v503_v23, %v502_v20 }
  0x77   :  { %1319 = vst [vmem:[#allocation2 + $0xf8] sm:$0xff] %v1256_v42  }
  0x78   :  { %1336 = shalt.err (!%p1333_p4)
}
  0x79   :  { %s1348_s9 = smov 64   ;;  %s1349_s10 = smov 4  }
  0x7a   :  { %835 = dma.vmem_to_hbm [thread:$0]  %s830_s7, 4096, %s1917_s5, [#allocation3], %s1348_s9, %s1348_s9, %s1349_s10  }
  0x7b   :  { %1345 = dma.done.wait [#allocation3], 4096  }
  0x7c   :  { %1346 = vsyncadd [#allocation3], 4294963200 }
  0x7d   :  { %839 = vsyncpa [#allocation3], 1 }

// kernel: f.2
= control target key start
LH: loop header
LB: loop body
LE: loop exit
PB: predicated region body
PF: predicated region fallthrough
CT: control target
= control target key end

     0   :  { %v2211_v0 = vmov 0   ;;  %s2935_s1 = inlined_call_operand.vmem [shape: bf16[256,128], index: 1, kind: input, shape index: {}]   ;;  %s2936_s0 = inlined_call_operand.vmem [shape: bf16[512,256], index: 0, kind: input, shape index: {}]   ;;  %s2937_s2 = inlined_call_operand.vmem [shape: bf16[512,128], index: 2, kind: output, shape index: {0}]   ;;  %s2938_s3 = inlined_call_operand.vmem [shape: f32[1,8,128], index: 3, kind: output, shape index: {1}]   ;;  %s2939_s4 = inlined_call_operand.vmem [shape: f32[1,8,128], index: 4, kind: output, shape index: {2}]  }
   0x1   :  { %659 = vmatprep.subr.bf16.mxu0 %v2211_v0  ;;  %v2099_v1 = vld [vmem:[%s2935_s1 + $0x38] sm:$0xff]   ;;  %2066 = vmatprep.subr.bf16.mxu1 %v2211_v0  ;;  %v2100_v2 = vld [vmem:[%s2935_s1 + $0x30] sm:$0xff]   ;;  %v2101_v3 = vld [vmem:[%s2935_s1 + $0x28] sm:$0xff]  }
   0x2   :  { %660 = vmatpush1.bf16.msra.mxu0 %v2099_v1  ;;  %2082 = vmatpush1.bf16.msra.mxu1 %v2099_v1  ;;  %v2102_v4 = vld [vmem:[%s2935_s1 + $0x20] sm:$0xff]   ;;  %v2103_v5 = vld [vmem:[%s2935_s1 + $0x18] sm:$0xff]   ;;  %v2104_v7 = vld [vmem:[%s2935_s1 + $0x10] sm:$0xff]  }
   0x3   :  { %661 = vmatprep.subr.bf16.mxu0 %v2211_v0  ;;  %2067 = vmatprep.subr.bf16.mxu1 %v2211_v0  ;;  %v2117_v6 = vld [vmem:[%s2936_s0 + $0x4] ss:$8 sps:$4 sm:$0xff]   ;;  %v2107_v11 = vld [vmem:[%s2935_s1 + $0x78] sm:$0xff]   ;;  %v2108_v12 = vld [vmem:[%s2935_s1 + $0x70] sm:$0xff]  }
   0x4   :  { %691 = vmatprep.mubr.bf16.mxu0 %v2117_v6  ;;  %v2105_v8 = vld [vmem:[%s2935_s1 + $0x8] sm:$0xff]   ;;  %v2106_v9 = vld [vmem:[%s2935_s1] sm:$0xff]   ;;  %v2111_v15 = vld [vmem:[%s2935_s1 + $0x58] sm:$0xff]  }
   0x5   :  { %v2141_v10 = vld [vmem:[%s2936_s0 + $0x104] ss:$8 sps:$4 sm:$0xff]   ;;  %v2112_v16 = vld [vmem:[%s2935_s1 + $0x50] sm:$0xff]   ;;  %v2115_v19 = vld [vmem:[%s2936_s0] ss:$8 sps:$4 sm:$0xff]  }
   0x6   :  { %662 = vmatpush1.bf16.msra.mxu0 %v2100_v2  ;;  %2083 = vmatpush1.bf16.msra.mxu1 %v2100_v2  ;;  %v2109_v13 = vld [vmem:[%s2935_s1 + $0x68] sm:$0xff]   ;;  %v2110_v14 = vld [vmem:[%s2935_s1 + $0x60] sm:$0xff]   ;;  %v2118_v21 = vld [vmem:[%s2936_s0 + $0x14] ss:$8 sps:$4 sm:$0xff]  }
   0x7   :  { %663 = vmatprep.subr.bf16.mxu0 %v2211_v0  ;;  %2068 = vmatprep.subr.bf16.mxu1 %v2211_v0  ;;  %v2113_v17 = vld [vmem:[%s2935_s1 + $0x48] sm:$0xff]   ;;  %v2114_v18 = vld [vmem:[%s2935_s1 + $0x40] sm:$0xff]   ;;  %v2145_v22 = vld [vmem:[%s2936_s0 + $0x114] ss:$8 sps:$4 sm:$0xff]  }
   0x8   :  { %819 = vmatprep.mubr.bf16.mxu1 %v2141_v10  ;;  %v2139_v20 = vld [vmem:[%s2936_s0 + $0x100] ss:$8 sps:$4 sm:$0xff]   ;;  %v2120_v23 = vld [vmem:[%s2936_s0 + $0x10] ss:$8 sps:$4 sm:$0xff]   ;;  %v2121_v25 = vld [vmem:[%s2936_s0 + $0x24] ss:$8 sps:$4 sm:$0xff]  }
   0x9   :  { %v2147_v24 = vld [vmem:[%s2936_s0 + $0x110] ss:$8 sps:$4 sm:$0xff]   ;;  %v2151_v26 = vld [vmem:[%s2936_s0 + $0x124] ss:$8 sps:$4 sm:$0xff]   ;;  %v2123_v27 = vld [vmem:[%s2936_s0 + $0x20] ss:$8 sps:$4 sm:$0xff]  }
   0xa   :  { %664 = vmatpush1.bf16.msra.mxu0 %v2101_v3  ;;  %2084 = vmatpush1.bf16.msra.mxu1 %v2101_v3  ;;  %v2153_v28 = vld [vmem:[%s2936_s0 + $0x120] ss:$8 sps:$4 sm:$0xff]   ;;  %v2124_v29 = vld [vmem:[%s2936_s0 + $0x34] ss:$8 sps:$4 sm:$0xff]   ;;  %v2126_v31 = vld [vmem:[%s2936_s0 + $0x30] ss:$8 sps:$4 sm:$0xff]  }
   0xb   :  { %665 = vmatprep.subr.bf16.mxu0 %v2211_v0  ;;  %2069 = vmatprep.subr.bf16.mxu1 %v2211_v0  ;;  %v2157_v30 = vld [vmem:[%s2936_s0 + $0x134] ss:$8 sps:$4 sm:$0xff]   ;;  %v2159_v32 = vld [vmem:[%s2936_s0 + $0x130] ss:$8 sps:$4 sm:$0xff]   ;;  %v2127_v33 = vld [vmem:[%s2936_s0 + $0x44] ss:$8 sps:$4 sm:$0xff]  }
   0xc   :  { %v2163_v34 = vld [vmem:[%s2936_s0 + $0x144] ss:$8 sps:$4 sm:$0xff]   ;;  %v2129_v35 = vld [vmem:[%s2936_s0 + $0x40] ss:$8 sps:$4 sm:$0xff]   ;;  %v2130_v37 = vld [vmem:[%s2936_s0 + $0x54] ss:$8 sps:$4 sm:$0xff]  }
   0xd   :  { %v2165_v36 = vld [vmem:[%s2936_s0 + $0x140] ss:$8 sps:$4 sm:$0xff]   ;;  %v2169_v38 = vld [vmem:[%s2936_s0 + $0x154] ss:$8 sps:$4 sm:$0xff]   ;;  %v2132_v39 = vld [vmem:[%s2936_s0 + $0x50] ss:$8 sps:$4 sm:$0xff]  }
   0xe   :  { %666 = vmatpush1.bf16.msra.mxu0 %v2102_v4  ;;  %2085 = vmatpush1.bf16.msra.mxu1 %v2102_v4  ;;  %v2171_v40 = vld [vmem:[%s2936_s0 + $0x150] ss:$8 sps:$4 sm:$0xff]   ;;  %v2133_v41 = vld [vmem:[%s2936_s0 + $0x64] ss:$8 sps:$4 sm:$0xff]   ;;  %v2135_v43 = vld [vmem:[%s2936_s0 + $0x60] ss:$8 sps:$4 sm:$0xff]  }
   0xf   :  { %667 = vmatprep.subr.bf16.mxu0 %v2211_v0  ;;  %2070 = vmatprep.subr.bf16.mxu1 %v2211_v0  ;;  %v2175_v42 = vld [vmem:[%s2936_s0 + $0x164] ss:$8 sps:$4 sm:$0xff]   ;;  %v2177_v44 = vld [vmem:[%s2936_s0 + $0x160] ss:$8 sps:$4 sm:$0xff]   ;;  %v2136_v45 = vld [vmem:[%s2936_s0 + $0x74] ss:$8 sps:$4 sm:$0xff]  }
  0x10   :  { %v2181_v46 = vld [vmem:[%s2936_s0 + $0x174] ss:$8 sps:$4 sm:$0xff]   ;;  %v2138_v47 = vld [vmem:[%s2936_s0 + $0x70] ss:$8 sps:$4 sm:$0xff]   ;;  %v2142_v49 = vld [vmem:[%s2936_s0 + $0x84] ss:$8 sps:$4 sm:$0xff]  }
  0x11   :  { %v2183_v48 = vld [vmem:[%s2936_s0 + $0x170] ss:$8 sps:$4 sm:$0xff]   ;;  %v2187_v50 = vld [vmem:[%s2936_s0 + $0x184] ss:$8 sps:$4 sm:$0xff]   ;;  %v2144_v51 = vld [vmem:[%s2936_s0 + $0x80] ss:$8 sps:$4 sm:$0xff]  }
  0x12   :  { %668 = vmatpush1.bf16.msra.mxu0 %v2103_v5  ;;  %2086 = vmatpush1.bf16.msra.mxu1 %v2103_v5  ;;  %v2189_v52 = vld [vmem:[%s2936_s0 + $0x180] ss:$8 sps:$4 sm:$0xff]   ;;  %v2148_v53 = vld [vmem:[%s2936_s0 + $0x94] ss:$8 sps:$4 sm:$0xff]   ;;  %v2150_v55 = vld [vmem:[%s2936_s0 + $0x90] ss:$8 sps:$4 sm:$0xff]  }
  0x13   :  { %669 = vmatprep.subr.bf16.mxu0 %v2211_v0  ;;  %2071 = vmatprep.subr.bf16.mxu1 %v2211_v0  ;;  %v2190_v54 = vld [vmem:[%s2936_s0 + $0x194] ss:$8 sps:$4 sm:$0xff]   ;;  %v2192_v56 = vld [vmem:[%s2936_s0 + $0x190] ss:$8 sps:$4 sm:$0xff]   ;;  %v2154_v57 = vld [vmem:[%s2936_s0 + $0xa4] ss:$8 sps:$4 sm:$0xff]  }
  0x14   :  { %v2193_v58 = vld [vmem:[%s2936_s0 + $0x1a4] ss:$8 sps:$4 sm:$0xff]   ;;  %v2156_v59 = vld [vmem:[%s2936_s0 + $0xa0] ss:$8 sps:$4 sm:$0xff]   ;;  %v2160_v61 = vld [vmem:[%s2936_s0 + $0xb4] ss:$8 sps:$4 sm:$0xff]  }
  0x15   :  { %v2195_v60 = vld [vmem:[%s2936_s0 + $0x1a0] ss:$8 sps:$4 sm:$0xff]   ;;  %v2196_v62 = vld [vmem:[%s2936_s0 + $0x1b4] ss:$8 sps:$4 sm:$0xff]   ;;  %v2162_v63 = vld [vmem:[%s2936_s0 + $0xb0] ss:$8 sps:$4 sm:$0xff]  }
  0x16   :  { %670 = vmatpush1.bf16.msra.mxu0 %v2104_v7  ;;  %2087 = vmatpush1.bf16.msra.mxu1 %v2104_v7  ;;  %v2166_v1 = vld [vmem:[%s2936_s0 + $0xc4] ss:$8 sps:$4 sm:$0xff]   ;;  %v2168_v3 = vld [vmem:[%s2936_s0 + $0xc0] ss:$8 sps:$4 sm:$0xff]   ;;  %v2172_v5 = vld [vmem:[%s2936_s0 + $0xd4] ss:$8 sps:$4 sm:$0xff]  }
  0x17   :  { %671 = vmatprep.subr.bf16.mxu0 %v2211_v0  ;;  %2072 = vmatprep.subr.bf16.mxu1 %v2211_v0  ;;  %v2199_v2 = vld [vmem:[%s2936_s0 + $0x1c4] ss:$8 sps:$4 sm:$0xff]   ;;  %v2201_v4 = vld [vmem:[%s2936_s0 + $0x1c0] ss:$8 sps:$4 sm:$0xff]   ;;  %v2202_v6 = vld [vmem:[%s2936_s0 + $0x1d4] ss:$8 sps:$4 sm:$0xff]  }
  0x18   :  { %v2174_v7 = vld [vmem:[%s2936_s0 + $0xd0] ss:$8 sps:$4 sm:$0xff]   ;;  %v2205_v10 = vld [vmem:[%s2936_s0 + $0x1e4] ss:$8 sps:$4 sm:$0xff]  }
  0x1a   :  { %672 = vmatpush1.bf16.msra.mxu0 %v2105_v8  ;;  %2088 = vmatpush1.bf16.msra.mxu1 %v2105_v8  ;;  %v2204_v8 = vld [vmem:[%s2936_s0 + $0x1d0] ss:$8 sps:$4 sm:$0xff]  }
  0x1b   :  { %673 = vmatprep.subr.bf16.mxu0 %v2211_v0  ;;  %2073 = vmatprep.subr.bf16.mxu1 %v2211_v0 }
  0x1e   :  { %674 = vmatpush1.bf16.msra.mxu0 %v2106_v9  ;;  %2089 = vmatpush1.bf16.msra.mxu1 %v2106_v9  ;;  %v2178_v9 = vld [vmem:[%s2936_s0 + $0xe4] ss:$8 sps:$4 sm:$0xff]  }
  0x1f   :  { %675 = vmatprep.subr.bf16.mxu0 %v2211_v0  ;;  %2074 = vmatprep.subr.bf16.mxu1 %v2211_v0 }
  0x22   :  { %676 = vmatpush2.bf16.msra.mxu0 %v2107_v11  ;;  %2090 = vmatpush2.bf16.msra.mxu1 %v2107_v11  ;;  %v2180_v11 = vld [vmem:[%s2936_s0 + $0xe0] ss:$8 sps:$4 sm:$0xff]  }
  0x23   :  { %677 = vmatprep.subr.bf16.mxu0 %v2211_v0  ;;  %2075 = vmatprep.subr.bf16.mxu1 %v2211_v0 }
  0x26   :  { %678 = vmatpush2.bf16.msra.mxu0 %v2108_v12  ;;  %2091 = vmatpush2.bf16.msra.mxu1 %v2108_v12  ;;  %v2207_v12 = vld [vmem:[%s2936_s0 + $0x1e0] ss:$8 sps:$4 sm:$0xff]  }
  0x27   :  { %679 = vmatprep.subr.bf16.mxu0 %v2211_v0  ;;  %2076 = vmatprep.subr.bf16.mxu1 %v2211_v0 }
  0x2a   :  { %680 = vmatpush2.bf16.msra.mxu0 %v2109_v13  ;;  %2092 = vmatpush2.bf16.msra.mxu1 %v2109_v13  ;;  %v2184_v13 = vld [vmem:[%s2936_s0 + $0xf4] ss:$8 sps:$4 sm:$0xff]  }
  0x2b   :  { %681 = vmatprep.subr.bf16.mxu0 %v2211_v0  ;;  %2077 = vmatprep.subr.bf16.mxu1 %v2211_v0 }
  0x2e   :  { %682 = vmatpush2.bf16.msra.mxu0 %v2110_v14  ;;  %2093 = vmatpush2.bf16.msra.mxu1 %v2110_v14  ;;  %v2208_v14 = vld [vmem:[%s2936_s0 + $0x1f4] ss:$8 sps:$4 sm:$0xff]  }
  0x2f   :  { %683 = vmatprep.subr.bf16.mxu0 %v2211_v0  ;;  %2078 = vmatprep.subr.bf16.mxu1 %v2211_v0 }
  0x32   :  { %684 = vmatpush2.bf16.msra.mxu0 %v2111_v15  ;;  %2094 = vmatpush2.bf16.msra.mxu1 %v2111_v15  ;;  %v2186_v15 = vld [vmem:[%s2936_s0 + $0xf0] ss:$8 sps:$4 sm:$0xff]  }
  0x33   :  { %685 = vmatprep.subr.bf16.mxu0 %v2211_v0  ;;  %2079 = vmatprep.subr.bf16.mxu1 %v2211_v0 }
  0x36   :  { %686 = vmatpush2.bf16.msra.mxu0 %v2112_v16  ;;  %2095 = vmatpush2.bf16.msra.mxu1 %v2112_v16  ;;  %v2210_v16 = vld [vmem:[%s2936_s0 + $0x1f0] ss:$8 sps:$4 sm:$0xff]  }
  0x37   :  { %687 = vmatprep.subr.bf16.mxu0 %v2211_v0  ;;  %2080 = vmatprep.subr.bf16.mxu1 %v2211_v0 }
  0x3a   :  { %688 = vmatpush2.bf16.msra.mxu0 %v2113_v17  ;;  %2096 = vmatpush2.bf16.msra.mxu1 %v2113_v17 }
  0x3b   :  { %689 = vmatprep.subr.bf16.mxu0 %v2211_v0  ;;  %2081 = vmatprep.subr.bf16.mxu1 %v2211_v0  ;;  %v2198_v0 = vld [vmem:[%s2936_s0 + $0x1b0] ss:$8 sps:$4 sm:$0xff]  }
  0x3e   :  { %690 = vmatpush2.bf16.msra.mxu0 %v2114_v18  ;;  %2097 = vmatpush2.bf16.msra.mxu1 %v2114_v18 }
  0x41   :  { %692 = vmatmul.mubr.bf16.vlgmr.msra.gmra.mxu0 %v2115_v19  ;;  %820 = vmatmul.mubr.bf16.vlgmr.msra.gmra.mxu1 %v2139_v20 }
  0x42   :  { %699 = vmatprep.mubr.bf16.mxu0 %v2118_v21  ;;  %827 = vmatprep.mubr.bf16.mxu1 %v2145_v22 }
  0x49   :  { %700 = vmatmul.mubr.bf16.gmra.mxu0 %v2120_v23  ;;  %828 = vmatmul.mubr.bf16.gmra.mxu1 %v2147_v24 }
  0x4a   :  { %707 = vmatprep.mubr.bf16.mxu0 %v2121_v25  ;;  %835 = vmatprep.mubr.bf16.mxu1 %v2151_v26 }
  0x51   :  { %708 = vmatmul.mubr.bf16.gmra.mxu0 %v2123_v27  ;;  %836 = vmatmul.mubr.bf16.gmra.mxu1 %v2153_v28 }
  0x52   :  { %715 = vmatprep.mubr.bf16.mxu0 %v2124_v29  ;;  %843 = vmatprep.mubr.bf16.mxu1 %v2157_v30 }
  0x59   :  { %716 = vmatmul.mubr.bf16.gmra.mxu0 %v2126_v31  ;;  %844 = vmatmul.mubr.bf16.gmra.mxu1 %v2159_v32 }
  0x5a   :  { %723 = vmatprep.mubr.bf16.mxu0 %v2127_v33  ;;  %851 = vmatprep.mubr.bf16.mxu1 %v2163_v34 }
  0x61   :  { %724 = vmatmul.mubr.bf16.gmra.mxu0 %v2129_v35  ;;  %852 = vmatmul.mubr.bf16.gmra.mxu1 %v2165_v36 }
  0x62   :  { %731 = vmatprep.mubr.bf16.mxu0 %v2130_v37  ;;  %859 = vmatprep.mubr.bf16.mxu1 %v2169_v38 }
  0x69   :  { %732 = vmatmul.mubr.bf16.gmra.mxu0 %v2132_v39  ;;  %860 = vmatmul.mubr.bf16.gmra.mxu1 %v2171_v40 }
  0x6a   :  { %739 = vmatprep.mubr.bf16.mxu0 %v2133_v41  ;;  %867 = vmatprep.mubr.bf16.mxu1 %v2175_v42 }
  0x71   :  { %740 = vmatmul.mubr.bf16.gmra.mxu0 %v2135_v43  ;;  %868 = vmatmul.mubr.bf16.gmra.mxu1 %v2177_v44 }
  0x72   :  { %747 = vmatprep.mubr.bf16.mxu0 %v2136_v45  ;;  %875 = vmatprep.mubr.bf16.mxu1 %v2181_v46 }
  0x79   :  { %748 = vmatmul.mubr.bf16.gmra.mxu0 %v2138_v47  ;;  %876 = vmatmul.mubr.bf16.gmra.mxu1 %v2183_v48 }
  0x7a   :  { %755 = vmatprep.mubr.bf16.mxu0 %v2142_v49  ;;  %883 = vmatprep.mubr.bf16.mxu1 %v2187_v50 }
  0x81   :  { %756 = vmatmul.mubr.bf16.gmra.mxu0 %v2144_v51  ;;  %884 = vmatmul.mubr.bf16.gmra.mxu1 %v2189_v52 }
  0x82   :  { %763 = vmatprep.mubr.bf16.mxu0 %v2148_v53  ;;  %891 = vmatprep.mubr.bf16.mxu1 %v2190_v54 }
  0x89   :  { %764 = vmatmul.mubr.bf16.gmra.mxu0 %v2150_v55  ;;  %892 = vmatmul.mubr.bf16.gmra.mxu1 %v2192_v56 }
  0x8a   :  { %771 = vmatprep.mubr.bf16.mxu0 %v2154_v57  ;;  %899 = vmatprep.mubr.bf16.mxu1 %v2193_v58 }
  0x91   :  { %772 = vmatmul.mubr.bf16.gmra.mxu0 %v2156_v59  ;;  %900 = vmatmul.mubr.bf16.gmra.mxu1 %v2195_v60 }
  0x92   :  { %779 = vmatprep.mubr.bf16.mxu0 %v2160_v61  ;;  %907 = vmatprep.mubr.bf16.mxu1 %v2196_v62 }
  0x99   :  { %780 = vmatmul.mubr.bf16.gmra.mxu0 %v2162_v63  ;;  %908 = vmatmul.mubr.bf16.gmra.mxu1 %v2198_v0 }
  0x9a   :  { %787 = vmatprep.mubr.bf16.mxu0 %v2166_v1  ;;  %915 = vmatprep.mubr.bf16.mxu1 %v2199_v2 }
  0xa1   :  { %788 = vmatmul.mubr.bf16.gmra.mxu0 %v2168_v3  ;;  %916 = vmatmul.mubr.bf16.gmra.mxu1 %v2201_v4 }
  0xa2   :  { %795 = vmatprep.mubr.bf16.mxu0 %v2172_v5  ;;  %923 = vmatprep.mubr.bf16.mxu1 %v2202_v6 }
  0xa9   :  { %796 = vmatmul.mubr.bf16.gmra.mxu0 %v2174_v7  ;;  %924 = vmatmul.mubr.bf16.gmra.mxu1 %v2204_v8 }
  0xaa   :  { %803 = vmatprep.mubr.bf16.mxu0 %v2178_v9  ;;  %931 = vmatprep.mubr.bf16.mxu1 %v2205_v10 }
  0xb1   :  { %804 = vmatmul.mubr.bf16.gmra.mxu0 %v2180_v11  ;;  %932 = vmatmul.mubr.bf16.gmra.mxu1 %v2207_v12 }
  0xb2   :  { %811 = vmatprep.mubr.bf16.mxu0 %v2184_v13  ;;  %939 = vmatprep.mubr.bf16.mxu1 %v2208_v14 }
  0xb9   :  { %812 = vmatmul.mubr.bf16.gmra.mxu0 %v2186_v15  ;;  %940 = vmatmul.mubr.bf16.gmra.mxu1 %v2210_v16 }
 0x101   :  { %v2509_v17 = vpop.f32.mrf.mxu0  ;;  %v2511_v18 = vpop.f32.mrf.mxu1 }
 0x103   :  { %v695_v19 = vpop.f32.mrf.mxu0  ;;  %v823_v20 = vpop.f32.mrf.mxu1 }
 0x105   :  { %v2513_v21 = vpop.f32.mrf.mxu0  ;;  %v2515_v22 = vpop.f32.mrf.mxu1 }
 0x106   :  { %v1878_v23 = vpack.c.bf16 %v2513_v21, %v2509_v17  ;;  %v1958_v24 = vpack.c.bf16 %v2515_v22, %v2511_v18 }
 0x107   :  { %v698_v25 = vpop.f32.mrf.mxu0  ;;  %v826_v26 = vpop.f32.mrf.mxu1 }
 0x108   :  { %1879 = vst [vmem:[%s2937_s2] sm:$0xff] %v1878_v23   ;;  %2050 = vst [vmem:[%s2937_s2 + $0x80] sm:$0xff] %v1958_v24  }
 0x109   :  { %v2527_v27 = vpop.f32.mrf.mxu0  ;;  %v2529_v28 = vpop.f32.mrf.mxu1 }
 0x10b   :  { %v703_v29 = vpop.f32.mrf.mxu0  ;;  %v831_v30 = vpop.f32.mrf.mxu1 }
 0x10d   :  { %v2531_v31 = vpop.f32.mrf.mxu0  ;;  %v2533_v32 = vpop.f32.mrf.mxu1 }
 0x10e   :  { %v1883_v33 = vpack.c.bf16 %v2531_v31, %v2527_v27  ;;  %v1963_v34 = vpack.c.bf16 %v2533_v32, %v2529_v28 }
 0x10f   :  { %v706_v35 = vpop.f32.mrf.mxu0  ;;  %v834_v36 = vpop.f32.mrf.mxu1 }
 0x110   :  { %2035 = vst [vmem:[%s2937_s2 + $0x8] sm:$0xff] %v1883_v33   ;;  %2051 = vst [vmem:[%s2937_s2 + $0x88] sm:$0xff] %v1963_v34  }
 0x111   :  { %v2545_v37 = vpop.f32.mrf.mxu0  ;;  %v2547_v38 = vpop.f32.mrf.mxu1 }
 0x113   :  { %v711_v39 = vpop.f32.mrf.mxu0  ;;  %v839_v40 = vpop.f32.mrf.mxu1 }
 0x115   :  { %v2549_v41 = vpop.f32.mrf.mxu0  ;;  %v2551_v42 = vpop.f32.mrf.mxu1 }
 0x116   :  { %v1888_v43 = vpack.c.bf16 %v2549_v41, %v2545_v37  ;;  %v1968_v44 = vpack.c.bf16 %v2551_v42, %v2547_v38 }
 0x117   :  { %v714_v45 = vpop.f32.mrf.mxu0  ;;  %v842_v46 = vpop.f32.mrf.mxu1 }
 0x118   :  { %2036 = vst [vmem:[%s2937_s2 + $0x10] sm:$0xff] %v1888_v43   ;;  %2052 = vst [vmem:[%s2937_s2 + $0x90] sm:$0xff] %v1968_v44   ;;  %v1528_v43 = vmul.f32 %v2513_v21, %v2513_v21  ;;  %v1527_v46 = vmul.f32 %v2509_v17, %v2509_v17 }
 0x119   :  { %v2563_v47 = vpop.f32.mrf.mxu0  ;;  %v2565_v48 = vpop.f32.mrf.mxu1 }
 0x11b   :  { %v719_v49 = vpop.f32.mrf.mxu0  ;;  %v847_v50 = vpop.f32.mrf.mxu1 }
 0x11c   :  { %v1529_v49 = vmul.f32 %v2527_v27, %v2527_v27 }
 0x11d   :  { %v2567_v51 = vpop.f32.mrf.mxu0  ;;  %v2569_v52 = vpop.f32.mrf.mxu1 }
 0x11e   :  { %v1893_v53 = vpack.c.bf16 %v2567_v51, %v2563_v47  ;;  %v1973_v54 = vpack.c.bf16 %v2569_v52, %v2565_v48 }
 0x11f   :  { %v722_v55 = vpop.f32.mrf.mxu0  ;;  %v850_v56 = vpop.f32.mrf.mxu1 }
 0x120   :  { %2037 = vst [vmem:[%s2937_s2 + $0x18] sm:$0xff] %v1893_v53   ;;  %2053 = vst [vmem:[%s2937_s2 + $0x98] sm:$0xff] %v1973_v54   ;;  %v1463_v54 = vadd.f32 %v2513_v21, %v2509_v17  ;;  %v1591_v55 = vadd.f32 %v1528_v43, %v1527_v46  ;;  %v1530_v56 = vmul.f32 %v2531_v31, %v2531_v31 }
 0x121   :  { %v2581_v57 = vpop.f32.mrf.mxu0  ;;  %v2583_v58 = vpop.f32.mrf.mxu1 }
 0x123   :  { %v727_v59 = vpop.f32.mrf.mxu0  ;;  %v855_v60 = vpop.f32.mrf.mxu1 }
 0x125   :  { %v2585_v61 = vpop.f32.mrf.mxu0  ;;  %v2587_v62 = vpop.f32.mrf.mxu1 }
 0x126   :  { %v1898_v63 = vpack.c.bf16 %v2585_v61, %v2581_v57  ;;  %v1978_v0 = vpack.c.bf16 %v2587_v62, %v2583_v58 }
 0x127   :  { %v730_v1 = vpop.f32.mrf.mxu0  ;;  %v858_v2 = vpop.f32.mrf.mxu1 }
 0x128   :  { %2038 = vst [vmem:[%s2937_s2 + $0x20] sm:$0xff] %v1898_v63   ;;  %2054 = vst [vmem:[%s2937_s2 + $0xa0] sm:$0xff] %v1978_v0   ;;  %v1464_v63 = vadd.f32 %v1463_v54, %v2527_v27  ;;  %v1592_v0 = vadd.f32 %v1591_v55, %v1529_v49  ;;  %v1531_v1 = vmul.f32 %v2545_v37, %v2545_v37 }
 0x129   :  { %v2599_v3 = vpop.f32.mrf.mxu0  ;;  %v2601_v4 = vpop.f32.mrf.mxu1  ;;  %v1532_v27 = vmul.f32 %v2549_v41, %v2549_v41 }
 0x12b   :  { %v735_v5 = vpop.f32.mrf.mxu0  ;;  %v863_v6 = vpop.f32.mrf.mxu1 }
 0x12c   :  { %v1465_v6 = vadd.f32 %v1464_v63, %v2531_v31 }
 0x12d   :  { %v2603_v7 = vpop.f32.mrf.mxu0  ;;  %v2605_v8 = vpop.f32.mrf.mxu1 }
 0x12e   :  { %v1903_v9 = vpack.c.bf16 %v2603_v7, %v2599_v3  ;;  %v1983_v10 = vpack.c.bf16 %v2605_v8, %v2601_v4 }
 0x12f   :  { %v738_v11 = vpop.f32.mrf.mxu0  ;;  %v866_v12 = vpop.f32.mrf.mxu1 }
 0x130   :  { %2039 = vst [vmem:[%s2937_s2 + $0x28] sm:$0xff] %v1903_v9   ;;  %2055 = vst [vmem:[%s2937_s2 + $0xa8] sm:$0xff] %v1983_v10   ;;  %v1593_v9 = vadd.f32 %v1592_v0, %v1530_v56  ;;  %v1466_v12 = vadd.f32 %v1465_v6, %v2545_v37  ;;  %v1534_v37 = vmul.f32 %v2567_v51, %v2567_v51 }
 0x131   :  { %v2617_v13 = vpop.f32.mrf.mxu0  ;;  %v2619_v14 = vpop.f32.mrf.mxu1 }
 0x132   :  { %v1594_v31 = vadd.f32 %v1593_v9, %v1531_v1 }
 0x133   :  { %v743_v15 = vpop.f32.mrf.mxu0  ;;  %v871_v16 = vpop.f32.mrf.mxu1 }
 0x134   :  { %v1533_v15 = vmul.f32 %v2563_v47, %v2563_v47 }
 0x135   :  { %v2621_v19 = vpop.f32.mrf.mxu0  ;;  %v2623_v20 = vpop.f32.mrf.mxu1 }
 0x136   :  { %v1908_v23 = vpack.c.bf16 %v2621_v19, %v2617_v13  ;;  %v1988_v24 = vpack.c.bf16 %v2623_v20, %v2619_v14 }
 0x137   :  { %v746_v25 = vpop.f32.mrf.mxu0  ;;  %v874_v26 = vpop.f32.mrf.mxu1 }
 0x138   :  { %2040 = vst [vmem:[%s2937_s2 + $0x30] sm:$0xff] %v1908_v23   ;;  %2056 = vst [vmem:[%s2937_s2 + $0xb0] sm:$0xff] %v1988_v24   ;;  %v1467_v24 = vadd.f32 %v1466_v12, %v2549_v41  ;;  %v1595_v25 = vadd.f32 %v1594_v31, %v1532_v27  ;;  %v1539_v27 = vmul.f32 %v2617_v13, %v2617_v13 }
 0x139   :  { %v2635_v29 = vpop.f32.mrf.mxu0  ;;  %v2637_v30 = vpop.f32.mrf.mxu1 }
 0x13b   :  { %v751_v33 = vpop.f32.mrf.mxu0  ;;  %v879_v34 = vpop.f32.mrf.mxu1 }
 0x13c   :  { %v1468_v34 = vadd.f32 %v1467_v24, %v2563_v47  ;;  %v1536_v47 = vmul.f32 %v2585_v61, %v2585_v61 }
 0x13d   :  { %v2639_v35 = vpop.f32.mrf.mxu0  ;;  %v2641_v36 = vpop.f32.mrf.mxu1 }
 0x13e   :  { %v1913_v39 = vpack.c.bf16 %v2639_v35, %v2635_v29  ;;  %v1993_v40 = vpack.c.bf16 %v2641_v36, %v2637_v30 }
 0x13f   :  { %v754_v44 = vpop.f32.mrf.mxu0  ;;  %v882_v45 = vpop.f32.mrf.mxu1 }
 0x140   :  { %2041 = vst [vmem:[%s2937_s2 + $0x38] sm:$0xff] %v1913_v39   ;;  %2057 = vst [vmem:[%s2937_s2 + $0xb8] sm:$0xff] %v1993_v40   ;;  %v1596_v39 = vadd.f32 %v1595_v25, %v1533_v15  ;;  %v1535_v40 = vmul.f32 %v2581_v57, %v2581_v57  ;;  %v1469_v45 = vadd.f32 %v1468_v34, %v2567_v51 }
 0x141   :  { %v2659_v50 = vpop.f32.mrf.mxu0  ;;  %v2661_v53 = vpop.f32.mrf.mxu1 }
 0x142   :  { %v1597_v49 = vadd.f32 %v1596_v39, %v1534_v37  ;;  %v1470_v56 = vadd.f32 %v1469_v45, %v2581_v57  ;;  %v1538_v57 = vmul.f32 %v2603_v7, %v2603_v7 }
 0x143   :  { %v759_v59 = vpop.f32.mrf.mxu0  ;;  %v887_v60 = vpop.f32.mrf.mxu1 }
 0x144   :  { %v1598_v51 = vadd.f32 %v1597_v49, %v1535_v40  ;;  %v1537_v59 = vmul.f32 %v2599_v3, %v2599_v3  ;;  %v1471_v0 = vadd.f32 %v1470_v56, %v2585_v61 }
 0x145   :  { %v2670_v2 = vpop.f32.mrf.mxu0  ;;  %v2672_v5 = vpop.f32.mrf.mxu1 }
 0x146   :  { %v1918_v17 = vpack.c.bf16 %v2670_v2, %v2659_v50  ;;  %v1998_v21 = vpack.c.bf16 %v2672_v5, %v2661_v53  ;;  %v1599_v1 = vadd.f32 %v1598_v51, %v1536_v47  ;;  %v1543_v47 = vmul.f32 %v2659_v50, %v2659_v50 }
 0x147   :  { %v762_v10 = vpop.f32.mrf.mxu0  ;;  %v890_v11 = vpop.f32.mrf.mxu1 }
 0x148   :  { %2042 = vst [vmem:[%s2937_s2 + $0x40] sm:$0xff] %v1918_v17   ;;  %2058 = vst [vmem:[%s2937_s2 + $0xc0] sm:$0xff] %v1998_v21   ;;  %v1472_v21 = vadd.f32 %v1471_v0, %v2599_v3  ;;  %v1600_v9 = vadd.f32 %v1599_v1, %v1537_v59  ;;  %v1540_v3 = vmul.f32 %v2621_v19, %v2621_v19 }
 0x149   :  { %v2690_v16 = vpop.f32.mrf.mxu0  ;;  %v2692_v23 = vpop.f32.mrf.mxu1  ;;  %v1544_v0 = vmul.f32 %v2670_v2, %v2670_v2 }
 0x14a   :  { %v1473_v12 = vadd.f32 %v1472_v21, %v2603_v7  ;;  %v1601_v15 = vadd.f32 %v1600_v9, %v1538_v57 }
 0x14b   :  { %v767_v26 = vpop.f32.mrf.mxu0  ;;  %v895_v33 = vpop.f32.mrf.mxu1 }
 0x14c   :  { %v1474_v37 = vadd.f32 %v1473_v12, %v2617_v13  ;;  %v1602_v7 = vadd.f32 %v1601_v15, %v1539_v27  ;;  %v1541_v26 = vmul.f32 %v2635_v29, %v2635_v29  ;;  %v1542_v13 = vmul.f32 %v2639_v35, %v2639_v35 }
 0x14d   :  { %v2700_v43 = vpop.f32.mrf.mxu0  ;;  %v2702_v44 = vpop.f32.mrf.mxu1 }
 0x14e   :  { %v1923_v41 = vpack.c.bf16 %v2700_v43, %v2690_v16  ;;  %v2003_v46 = vpack.c.bf16 %v2702_v44, %v2692_v23  ;;  %v1475_v39 = vadd.f32 %v1474_v37, %v2621_v19  ;;  %v1603_v40 = vadd.f32 %v1602_v7, %v1540_v3 }
 0x14f   :  { %v770_v54 = vpop.f32.mrf.mxu0  ;;  %v898_v55 = vpop.f32.mrf.mxu1 }
 0x150   :  { %2043 = vst [vmem:[%s2937_s2 + $0x48] sm:$0xff] %v1923_v41   ;;  %2059 = vst [vmem:[%s2937_s2 + $0xc8] sm:$0xff] %v2003_v46   ;;  %v1476_v46 = vadd.f32 %v1475_v39, %v2635_v29  ;;  %v1604_v49 = vadd.f32 %v1603_v40, %v1541_v26 }
 0x151   :  { %v2720_v60 = vpop.f32.mrf.mxu0  ;;  %v2722_v63 = vpop.f32.mrf.mxu1 }
 0x152   :  { %v1477_v56 = vadd.f32 %v1476_v46, %v2639_v35  ;;  %v1605_v59 = vadd.f32 %v1604_v49, %v1542_v13  ;;  %v1547_v3 = vmul.f32 %v2720_v60, %v2720_v60 }
 0x153   :  { %v775_v6 = vpop.f32.mrf.mxu0  ;;  %v903_v17 = vpop.f32.mrf.mxu1 }
 0x154   :  { %v1478_v29 = vadd.f32 %v1477_v56, %v2659_v50  ;;  %v1606_v35 = vadd.f32 %v1605_v59, %v1543_v47  ;;  %v1545_v6 = vmul.f32 %v2690_v16, %v2690_v16  ;;  %v1546_v50 = vmul.f32 %v2700_v43, %v2700_v43 }
 0x155   :  { %v2730_v10 = vpop.f32.mrf.mxu0  ;;  %v2732_v11 = vpop.f32.mrf.mxu1 }
 0x156   :  { %v1928_v61 = vpack.c.bf16 %v2730_v10, %v2720_v60  ;;  %v2008_v31 = vpack.c.bf16 %v2732_v11, %v2722_v63  ;;  %v1479_v9 = vadd.f32 %v1478_v29, %v2670_v2  ;;  %v1607_v27 = vadd.f32 %v1606_v35, %v1544_v0 }
 0x157   :  { %v778_v24 = vpop.f32.mrf.mxu0  ;;  %v906_v25 = vpop.f32.mrf.mxu1  ;;  %v1548_v39 = vmul.f32 %v2730_v10, %v2730_v10 }
 0x158   :  { %2044 = vst [vmem:[%s2937_s2 + $0x50] sm:$0xff] %v1928_v61   ;;  %2060 = vst [vmem:[%s2937_s2 + $0xd0] sm:$0xff] %v2008_v31   ;;  %v1480_v31 = vadd.f32 %v1479_v9, %v2690_v16  ;;  %v1608_v15 = vadd.f32 %v1607_v27, %v1545_v6 }
 0x159   :  { %v781_v33 = vpop.f32.mrf.mxu0  ;;  %v2750_v34 = vpop.f32.mrf.mxu1 }
 0x15a   :  { %v1481_v37 = vadd.f32 %v1480_v31, %v2700_v43  ;;  %v1609_v26 = vadd.f32 %v1608_v15, %v1546_v50 }
 0x15b   :  { %v783_v45 = vpop.f32.mrf.mxu0  ;;  %v911_v41 = vpop.f32.mrf.mxu1 }
 0x15c   :  { %v1482_v16 = vadd.f32 %v1481_v37, %v2720_v60  ;;  %v1610_v43 = vadd.f32 %v1609_v26, %v1547_v3  ;;  %v1549_v45 = vmul.f32 %v781_v33, %v781_v33 }
 0x15d   :  { %v784_v54 = vpop.f32.mrf.mxu0  ;;  %v2758_v55 = vpop.f32.mrf.mxu1 }
 0x15e   :  { %v1933_v51 = vpack.c.bf16 %v784_v54, %v781_v33  ;;  %v2013_v19 = vpack.c.bf16 %v2758_v55, %v2750_v34  ;;  %v1483_v49 = vadd.f32 %v1482_v16, %v2730_v10  ;;  %v1611_v47 = vadd.f32 %v1610_v43, %v1548_v39 }
 0x15f   :  { %v786_v1 = vpop.f32.mrf.mxu0  ;;  %v914_v57 = vpop.f32.mrf.mxu1  ;;  %v1550_v56 = vmul.f32 %v784_v54, %v784_v54 }
 0x160   :  { %2045 = vst [vmem:[%s2937_s2 + $0x58] sm:$0xff] %v1933_v51   ;;  %2061 = vst [vmem:[%s2937_s2 + $0xd8] sm:$0xff] %v2013_v19   ;;  %v1484_v60 = vadd.f32 %v1483_v49, %v781_v33  ;;  %v1612_v59 = vadd.f32 %v1611_v47, %v1549_v45 }
 0x161   :  { %v789_v17 = vpop.f32.mrf.mxu0  ;;  %v2774_v21 = vpop.f32.mrf.mxu1 }
 0x162   :  { %v1551_v0 = vmul.f32 %v789_v17, %v789_v17  ;;  %v1485_v29 = vadd.f32 %v1484_v60, %v784_v54  ;;  %v1613_v9 = vadd.f32 %v1612_v59, %v1550_v56 }
 0x163   :  { %v791_v12 = vpop.f32.mrf.mxu0  ;;  %v919_v61 = vpop.f32.mrf.mxu1 }
 0x164   :  { %v1486_v10 = vadd.f32 %v1485_v29, %v789_v17  ;;  %v1614_v33 = vadd.f32 %v1613_v9, %v1551_v0 }
 0x165   :  { %v792_v24 = vpop.f32.mrf.mxu0  ;;  %v2782_v25 = vpop.f32.mrf.mxu1 }
 0x166   :  { %v1938_v7 = vpack.c.bf16 %v792_v24, %v789_v17  ;;  %v2018_v2 = vpack.c.bf16 %v2782_v25, %v2774_v21  ;;  %v1552_v27 = vmul.f32 %v792_v24, %v792_v24  ;;  %v1487_v15 = vadd.f32 %v1486_v10, %v792_v24 }
 0x167   :  { %v794_v40 = vpop.f32.mrf.mxu0  ;;  %v922_v13 = vpop.f32.mrf.mxu1 }
 0x168   :  { %2046 = vst [vmem:[%s2937_s2 + $0x60] sm:$0xff] %v1938_v7   ;;  %2062 = vst [vmem:[%s2937_s2 + $0xe0] sm:$0xff] %v2018_v2   ;;  %v1615_v3 = vadd.f32 %v1614_v33, %v1552_v27 }
 0x169   :  { %v797_v41 = vpop.f32.mrf.mxu0  ;;  %v2796_v46 = vpop.f32.mrf.mxu1 }
 0x16a   :  { %v1553_v61 = vmul.f32 %v797_v41, %v797_v41  ;;  %v1488_v26 = vadd.f32 %v1487_v15, %v797_v41 }
 0x16b   :  { %v799_v51 = vpop.f32.mrf.mxu0  ;;  %v927_v19 = vpop.f32.mrf.mxu1 }
 0x16c   :  { %v1616_v17 = vadd.f32 %v1615_v3, %v1553_v61  ;;  %v1559_v3 = vmul.f32 %v2511_v18, %v2511_v18 }
 0x16d   :  { %v800_v1 = vpop.f32.mrf.mxu0  ;;  %v2799_v57 = vpop.f32.mrf.mxu1 }
 0x16e   :  { %v1943_v35 = vpack.c.bf16 %v800_v1, %v797_v41  ;;  %v2023_v6 = vpack.c.bf16 %v2799_v57, %v2796_v46  ;;  %v1554_v37 = vmul.f32 %v800_v1, %v800_v1  ;;  %v1489_v16 = vadd.f32 %v1488_v26, %v800_v1 }
 0x16f   :  { %v802_v50 = vpop.f32.mrf.mxu0  ;;  %v930_v12 = vpop.f32.mrf.mxu1 }
 0x170   :  { %2047 = vst [vmem:[%s2937_s2 + $0x68] sm:$0xff] %v1943_v35   ;;  %2063 = vst [vmem:[%s2937_s2 + $0xe8] sm:$0xff] %v2023_v6   ;;  %v1617_v49 = vadd.f32 %v1616_v17, %v1554_v37 }
 0x171   :  { %v805_v54 = vpop.f32.mrf.mxu0  ;;  %v2809_v31 = vpop.f32.mrf.mxu1 }
 0x172   :  { %v1555_v39 = vmul.f32 %v805_v54, %v805_v54  ;;  %v1490_v24 = vadd.f32 %v1489_v16, %v805_v54 }
 0x173   :  { %v807_v7 = vpop.f32.mrf.mxu0  ;;  %v935_v2 = vpop.f32.mrf.mxu1 }
 0x174   :  { %v1618_v41 = vadd.f32 %v1617_v49, %v1555_v39  ;;  %v1560_v2 = vmul.f32 %v2515_v22, %v2515_v22  ;;  %v1561_v39 = vmul.f32 %v2529_v28, %v2529_v28  ;;  %v1563_v49 = vmul.f32 %v2547_v38, %v2547_v38 }
 0x175   :  { %v808_v40 = vpop.f32.mrf.mxu0  ;;  %v2811_v13 = vpop.f32.mrf.mxu1 }
 0x176   :  { %v1948_v43 = vpack.c.bf16 %v808_v40, %v805_v54  ;;  %v2028_v45 = vpack.c.bf16 %v2811_v13, %v2809_v31  ;;  %v1556_v47 = vmul.f32 %v808_v40, %v808_v40  ;;  %v1491_v59 = vadd.f32 %v1490_v24, %v808_v40 }
 0x177   :  { %v810_v56 = vpop.f32.mrf.mxu0  ;;  %v938_v51 = vpop.f32.mrf.mxu1 }
 0x178   :  { %2048 = vst [vmem:[%s2937_s2 + $0x70] sm:$0xff] %v1948_v43   ;;  %2064 = vst [vmem:[%s2937_s2 + $0xf0] sm:$0xff] %v2028_v45   ;;  %v1619_v1 = vadd.f32 %v1618_v41, %v1556_v47 }
 0x179   :  { %v813_v19 = vpop.f32.mrf.mxu0  ;;  %v2821_v60 = vpop.f32.mrf.mxu1 }
 0x17a   :  { %v1557_v0 = vmul.f32 %v813_v19, %v813_v19  ;;  %v1492_v6 = vadd.f32 %v1491_v59, %v813_v19 }
 0x17b   :  { %v815_v29 = vpop.f32.mrf.mxu0  ;;  %v943_v35 = vpop.f32.mrf.mxu1 }
 0x17c   :  { %v1620_v9 = vadd.f32 %v1619_v1, %v1557_v0 }
 0x17d   :  { %v816_v27 = vpop.f32.mrf.mxu0  ;;  %v2823_v50 = vpop.f32.mrf.mxu1 }
 0x17e   :  { %v1953_v12 = vpack.c.bf16 %v816_v27, %v813_v19  ;;  %v1493_v10 = vadd.f32 %v1492_v6, %v816_v27  ;;  %v1558_v33 = vmul.f32 %v816_v27, %v816_v27  ;;  %v2033_v61 = vpack.c.bf16 %v2823_v50, %v2821_v60 }
 0x17f   :  { %v818_v54 = vpop.f32.mrf.mxu0  ;;  %v946_v15 = vpop.f32.mrf.mxu1 }
 0x180   :  { %2049 = vst [vmem:[%s2937_s2 + $0x78] sm:$0xff] %v1953_v12   ;;  %v1494_v37 = vadd.f32 %v1493_v10, %v2511_v18  ;;  %v1621_v7 = vadd.f32 %v1620_v9, %v1558_v33  ;;  %2065 = vst [vmem:[%s2937_s2 + $0xf8] sm:$0xff] %v2033_v61   ;;  %v1562_v18 = vmul.f32 %v2533_v32, %v2533_v32 }
 0x182   :  { %v1495_v26 = vadd.f32 %v1494_v37, %v2515_v22  ;;  %v1622_v17 = vadd.f32 %v1621_v7, %v1559_v3  ;;  %v1564_v22 = vmul.f32 %v2551_v42, %v2551_v42 }
 0x184   :  { %v1496_v40 = vadd.f32 %v1495_v26, %v2529_v28  ;;  %v1623_v16 = vadd.f32 %v1622_v17, %v1560_v2  ;;  %v1565_v28 = vmul.f32 %v2565_v48, %v2565_v48 }
 0x186   :  { %v1497_v43 = vadd.f32 %v1496_v40, %v2533_v32  ;;  %v1624_v45 = vadd.f32 %v1623_v16, %v1561_v39  ;;  %v1566_v32 = vmul.f32 %v2569_v52, %v2569_v52  ;;  %v1576_v39 = vmul.f32 %v2672_v5, %v2672_v5 }
 0x188   :  { %v1498_v47 = vadd.f32 %v1497_v43, %v2547_v38  ;;  %v1625_v56 = vadd.f32 %v1624_v45, %v1562_v18  ;;  %v1567_v38 = vmul.f32 %v2583_v58, %v2583_v58  ;;  %v1577_v18 = vmul.f32 %v2692_v23, %v2692_v23 }
 0x189   :  { %v1578_v45 = vmul.f32 %v2702_v44, %v2702_v44 }
 0x18a   :  { %v1499_v51 = vadd.f32 %v1498_v47, %v2551_v42  ;;  %v1626_v24 = vadd.f32 %v1625_v56, %v1563_v49  ;;  %v1568_v42 = vmul.f32 %v2587_v62, %v2587_v62  ;;  %v1579_v47 = vmul.f32 %v2722_v63, %v2722_v63 }
 0x18c   :  { %v1500_v41 = vadd.f32 %v1499_v51, %v2565_v48  ;;  %v1627_v19 = vadd.f32 %v1626_v24, %v1564_v22  ;;  %v1569_v48 = vmul.f32 %v2601_v4, %v2601_v4  ;;  %v1580_v22 = vmul.f32 %v2732_v11, %v2732_v11 }
 0x18d   :  { %v1581_v24 = vmul.f32 %v2750_v34, %v2750_v34 }
 0x18e   :  { %v1501_v59 = vadd.f32 %v1500_v41, %v2569_v52  ;;  %v1628_v0 = vadd.f32 %v1627_v19, %v1565_v28  ;;  %v1570_v52 = vmul.f32 %v2605_v8, %v2605_v8  ;;  %v1582_v41 = vmul.f32 %v2758_v55, %v2758_v55 }
 0x190   :  { %v1629_v1 = vadd.f32 %v1628_v0, %v1566_v32  ;;  %v1502_v29 = vadd.f32 %v1501_v59, %v2583_v58  ;;  %v1571_v58 = vmul.f32 %v2619_v14, %v2619_v14  ;;  %v1583_v32 = vmul.f32 %v2774_v21, %v2774_v21 }
 0x191   :  { %v1584_v0 = vmul.f32 %v2782_v25, %v2782_v25 }
 0x192   :  { %v1503_v35 = vadd.f32 %v1502_v29, %v2587_v62  ;;  %v1630_v6 = vadd.f32 %v1629_v1, %v1567_v38  ;;  %v1572_v62 = vmul.f32 %v2623_v20, %v2623_v20  ;;  %v1585_v1 = vmul.f32 %v2796_v46, %v2796_v46 }
 0x194   :  { %v1504_v9 = vadd.f32 %v1503_v35, %v2601_v4  ;;  %v1631_v27 = vadd.f32 %v1630_v6, %v1568_v42  ;;  %v1573_v4 = vmul.f32 %v2637_v30, %v2637_v30  ;;  %v1586_v42 = vmul.f32 %v2799_v57, %v2799_v57 }
 0x195   :  { %v1587_v6 = vmul.f32 %v2809_v31, %v2809_v31 }
 0x196   :  { %v1505_v12 = vadd.f32 %v1504_v9, %v2605_v8  ;;  %v1632_v10 = vadd.f32 %v1631_v27, %v1569_v48  ;;  %v1574_v8 = vmul.f32 %v2641_v36, %v2641_v36  ;;  %v1588_v9 = vmul.f32 %v2811_v13, %v2811_v13 }
 0x198   :  { %v1506_v33 = vadd.f32 %v1505_v12, %v2619_v14  ;;  %v1633_v61 = vadd.f32 %v1632_v10, %v1570_v52  ;;  %v1575_v14 = vmul.f32 %v2661_v53, %v2661_v53  ;;  %v1589_v52 = vmul.f32 %v2821_v60, %v2821_v60 }
 0x199   :  { %v1590_v10 = vmul.f32 %v2823_v50, %v2823_v50 }
 0x19a   :  { %v1507_v54 = vadd.f32 %v1506_v33, %v2623_v20  ;;  %v1634_v15 = vadd.f32 %v1633_v61, %v1571_v58 }
 0x19c   :  { %v1508_v3 = vadd.f32 %v1507_v54, %v2637_v30  ;;  %v1635_v37 = vadd.f32 %v1634_v15, %v1572_v62 }
 0x19e   :  { %v1509_v7 = vadd.f32 %v1508_v3, %v2641_v36  ;;  %v1636_v2 = vadd.f32 %v1635_v37, %v1573_v4 }
 0x1a0   :  { %v1510_v26 = vadd.f32 %v1509_v7, %v2661_v53  ;;  %v1637_v17 = vadd.f32 %v1636_v2, %v1574_v8 }
 0x1a2   :  { %v1511_v20 = vadd.f32 %v1510_v26, %v2672_v5  ;;  %v1638_v40 = vadd.f32 %v1637_v17, %v1575_v14 }
 0x1a4   :  { %v1639_v30 = vadd.f32 %v1638_v40, %v1576_v39  ;;  %v1512_v16 = vadd.f32 %v1511_v20, %v2692_v23 }
 0x1a6   :  { %v1640_v36 = vadd.f32 %v1639_v30, %v1577_v18  ;;  %v1513_v43 = vadd.f32 %v1512_v16, %v2702_v44 }
 0x1a8   :  { %v1641_v53 = vadd.f32 %v1640_v36, %v1578_v45  ;;  %v1514_v49 = vadd.f32 %v1513_v43, %v2722_v63 }
 0x1aa   :  { %v1642_v5 = vadd.f32 %v1641_v53, %v1579_v47  ;;  %v1515_v56 = vadd.f32 %v1514_v49, %v2732_v11 }
 0x1ac   :  { %v1643_v51 = vadd.f32 %v1642_v5, %v1580_v22  ;;  %v1516_v23 = vadd.f32 %v1515_v56, %v2750_v34 }
 0x1ae   :  { %v1644_v28 = vadd.f32 %v1643_v51, %v1581_v24  ;;  %v1517_v44 = vadd.f32 %v1516_v23, %v2758_v55 }
 0x1b0   :  { %v1645_v19 = vadd.f32 %v1644_v28, %v1582_v41  ;;  %v1518_v63 = vadd.f32 %v1517_v44, %v2774_v21 }
 0x1b2   :  { %v1646_v59 = vadd.f32 %v1645_v19, %v1583_v32  ;;  %v1519_v11 = vadd.f32 %v1518_v63, %v2782_v25 }
 0x1b4   :  { %v1647_v38 = vadd.f32 %v1646_v59, %v1584_v0  ;;  %v1520_v34 = vadd.f32 %v1519_v11, %v2796_v46 }
 0x1b6   :  { %v1648_v29 = vadd.f32 %v1647_v38, %v1585_v1  ;;  %v1521_v55 = vadd.f32 %v1520_v34, %v2799_v57 }
 0x1b8   :  { %v1649_v35 = vadd.f32 %v1648_v29, %v1586_v42  ;;  %v1522_v21 = vadd.f32 %v1521_v55, %v2809_v31 }
 0x1ba   :  { %v1650_v48 = vadd.f32 %v1649_v35, %v1587_v6  ;;  %v1523_v25 = vadd.f32 %v1522_v21, %v2811_v13 }
 0x1bc   :  { %v1651_v27 = vadd.f32 %v1650_v48, %v1588_v9  ;;  %v1524_v46 = vadd.f32 %v1523_v25, %v2821_v60 }
 0x1be   :  { %v1652_v12 = vadd.f32 %v1651_v27, %v1589_v52  ;;  %v1525_v57 = vadd.f32 %v1524_v46, %v2823_v50 }
 0x1c0   :  { %1526 = vst [vmem:[%s2938_s3] sm:$0xff] %v1525_v57  ;;  %v1653_v31 = vadd.f32 %v1652_v12, %v1590_v10 }
 0x1c2   :  { %1654 = vst [vmem:[%s2939_s4] sm:$0xff] %v1653_v31 }

</bundles_post_ra>
